<compile_context>
chip_gen: v7x
topology: tpu7x:2x2x1
jax: 0.10.0
libtpu: 0.0.40
codegen_flags: <defaults>
</compile_context>

<pallas_src>
import jax
import jax.numpy as jnp
from jax import lax
from jax.experimental import pallas as pl
from jax.experimental.pallas import tpu as pltpu


def _bisic_block_kernel(x_ref, w1_ref, w2_ref, b1_ref, b2_ref, o_ref, hpad_ref):
    # x_ref   : (NB*(H+2), WC) bf16  NB per-image vertically zero-padded input slabs, stacked
    # w1_ref  : (3, WC, WC)    bf16  banded conv1 weights (clipped band, BN1 scale folded)
    # w2_ref  : (3, WC, WC)    bf16  banded conv2 weights (clipped band, BN2 scale folded)
    # b1_ref, b2_ref : (1, WC) f32   BN shifts tiled over W
    # o_ref   : (NB*H, WC)     f32
    # hpad_ref: (NB*(H+2), WC) bf16  scratch: per-image padded relu(bn1(conv1(x))) slab
    M, WC = x_ref.shape
    NBH = o_ref.shape[0]
    NB = (M - NBH) // 2          # images per grid step
    H = NBH // NB
    HP = H + 2                   # padded per-image height
    MV = M - 2                   # rows of the stacked conv-output slab (valid + junk rows)

    xs = x_ref[...]                                       # (M, WC) bf16

    # ---- conv1 (3x3, pad 1) + folded BN1 scale: 3 row-shifted MXU matmuls over
    #      the whole stacked slab.  First tap initializes the accumulator (no
    #      zeros + extra add; helps the v5e/v6e MRF path, free on v7x).
    acc1 = jnp.dot(xs[0:MV], w1_ref[0], preferred_element_type=jnp.float32)
    for kh in (1, 2):
        acc1 = acc1 + jnp.dot(xs[kh:kh + MV], w1_ref[kh],
                              preferred_element_type=jnp.float32)
    # TODO(synk): on v6e/v7x a single K=3*WC matmul (taps packed along K) may
    # fill the 256-wide MXU better; keep the 3-tap form until measured.

    # ---- BN1 shift + ReLU -> bf16, written into the padded scratch slab ----
    # acc1 slab row p (= image i, output row h, with p = i*HP + h) belongs at
    # scratch row p+1, so one shifted full-slab store covers every image; the
    # junk rows at image boundaries land exactly on the border rows, which are
    # then re-zeroed (this also clears the uninitialized rows 0 / M-1 each
    # step, keeping the kernel safe if the parallel grid axis is split across
    # TensorCores).
    hpad_ref[pl.ds(1, MV), :] = jnp.maximum(acc1 + b1_ref[0], 0.0).astype(jnp.bfloat16)
    zrow = jnp.zeros((1, WC), jnp.bfloat16)
    for i in range(NB):
        hpad_ref[pl.ds(i * HP, 1), :] = zrow              # top border of image i
        hpad_ref[pl.ds(i * HP + H + 1, 1), :] = zrow      # bottom border of image i

    # ---- conv2 (3x3, pad 1) + folded BN2 scale ----
    hs = hpad_ref[...]                                    # (M, WC) bf16
    acc2 = jnp.dot(hs[0:MV], w2_ref[0], preferred_element_type=jnp.float32)
    for kh in (1, 2):
        acc2 = acc2 + jnp.dot(hs[kh:kh + MV], w2_ref[kh],
                              preferred_element_type=jnp.float32)

    # ---- BN2 shift + residual add + ReLU ----
    # Residual rows for conv-output row p sit at xs row p+1 (the interior rows
    # of the padded input slab).  NOTE: residual is taken from the bf16 input
    # (small precision loss vs a separate f32 skip stream; saves HBM traffic).
    out = jnp.maximum(acc2 + b2_ref[0] + xs[1:M - 1].astype(jnp.float32), 0.0)
    # Store only the H valid rows per image; junk boundary rows are never written.
    for i in range(NB):
        o_ref[pl.ds(i * H, H), :] = out[i * HP:i * HP + H].astype(o_ref.dtype)


def _banded_conv_weight(w_hwio, scale, out_w):
    """(3, 3, Cin, Cout) HWIO conv weights -> (3, out_w*Cin, out_w*Cout) banded
    matrices such that, for a vertically padded row-slab X (rows = padded image
    rows, lanes = W*Cin):  conv(x)[h, :] == sum_kh X[h + kh, :] @ banded[kh].
    Width padding (pad=1) is encoded by clipping the band, so K is exactly
    W*Cin (lane-aligned).  The per-output-channel BN scale is folded in."""
    kh_, kw_, cin, cout = w_hwio.shape
    big = jnp.zeros((kh_, out_w, cin, out_w, cout), jnp.float32)
    for kw in range(kw_):
        off = kw - 1                                          # input col = out col + off
        e = jnp.eye(out_w, out_w, k=-off, dtype=jnp.float32)  # e[w + off, w] = 1
        big = big + jnp.einsum('pw,hio->hpiwo', e, w_hwio[:, kw])
    big = big * scale.reshape(1, 1, 1, 1, cout)
    return big.reshape(kh_, out_w * cin, out_w * cout)


def bisic_block_pallas(x_nchw, w1_oihw, w2_oihw,
                       g1, be1, rm1, rv1, g2, be2, rm2, rv2,
                       eps=1e-5, images_per_step=None):
    """Forward of BisicBlock (eval mode, stride=1, downsample=None). x: (N,C,H,W)."""
    N, C, H, W = x_nchw.shape
    WC = W * C
    HP = H + 2

    # Guard: the banded construction replicates every 3x3 tap W times; real
    # ResNet widths need W/halo tiling (TODO above) before this blows up VMEM.
    assert 2 * 3 * WC * WC * 2 <= 8 * 1024 * 1024, (
        "banded conv weights too large for VMEM; width tiling not implemented")

    # ---- choose how many images share one grid step (batched onto the M axis).
    # Default aims for 2 parallel grid steps so both v7x TensorCores get work.
    if images_per_step is None:
        nb = max(1, (N + 1) // 2)
    else:
        nb = max(1, min(int(images_per_step), N))
    nb = min(nb, max(1, 512 // HP))          # soft cap on slab rows per step
    n_total = -(-N // nb) * nb               # pad batch to a multiple of nb
    # Mosaic (8,128) tiling: a block's sublane extent must be a multiple of 8
    # unless the block spans the whole array -> fall back to a single step.
    if (n_total // nb) > 1 and ((nb * HP) % 8 or (nb * H) % 8):
        nb = n_total
    n_pad = n_total - N
    grid_steps = n_total // nb

    # ---- single bf16 input stream: NCHW -> NHWC, vertical (+batch) zero pad,
    #      fold W into the lane axis.  (XLA fuses transpose+pad+cast.)
    x_nhwc = jnp.transpose(x_nchw, (0, 2, 3, 1)).astype(jnp.float32)      # (N,H,W,C)
    xp = jnp.pad(x_nhwc, ((0, n_pad), (1, 1), (0, 0), (0, 0)))
    xp = xp.reshape(n_total * HP, WC).astype(jnp.bfloat16)                # (n_total*HP, WC)

    # OIHW -> HWIO
    w1 = jnp.transpose(w1_oihw, (2, 3, 1, 0)).astype(jnp.float32)
    w2 = jnp.transpose(w2_oihw, (2, 3, 1, 0)).astype(jnp.float32)

    # Fold BN (inference mode) into per-channel scale / shift.
    s1 = g1 / jnp.sqrt(rv1 + eps)
    b1 = be1 - rm1 * s1
    s2 = g2 / jnp.sqrt(rv2 + eps)
    b2 = be2 - rm2 * s2

    bw1 = _banded_conv_weight(w1, s1, W).astype(jnp.bfloat16)             # (3, WC, WC)
    bw2 = _banded_conv_weight(w2, s2, W).astype(jnp.bfloat16)             # (3, WC, WC)
    b1t = jnp.tile(b1.astype(jnp.float32), W).reshape(1, WC)
    b2t = jnp.tile(b2.astype(jnp.float32), W).reshape(1, WC)

    out2d = pl.pallas_call(
        _bisic_block_kernel,
        out_shape=jax.ShapeDtypeStruct((n_total * H, WC), jnp.float32),
        grid=(grid_steps,),
        in_specs=[
            pl.BlockSpec((nb * HP, WC), lambda n: (n, 0)),   # stacked padded input slabs
            pl.BlockSpec((3, WC, WC), lambda n: (0, 0, 0)),  # banded conv1 weights
            pl.BlockSpec((3, WC, WC), lambda n: (0, 0, 0)),  # banded conv2 weights
            pl.BlockSpec((1, WC), lambda n: (0, 0)),         # BN1 shift
            pl.BlockSpec((1, WC), lambda n: (0, 0)),         # BN2 shift
        ],
        out_specs=pl.BlockSpec((nb * H, WC), lambda n: (n, 0)),
        scratch_shapes=[pltpu.VMEM((nb * HP, WC), jnp.bfloat16)],
        compiler_params=pltpu.CompilerParams(
            dimension_semantics=("parallel",),
            vmem_limit_bytes=32 * 1024 * 1024),
    )(xp, bw1, bw2, b1t, b2t)

    # (n_total*H, W*C) -> (N, H, W, C) -> NCHW
    out = out2d.reshape(n_total, H, W, C)[:N]
    return jnp.transpose(out, (0, 3, 1, 2))


def _reference(x, w1, w2, g1, be1, rm1, rv1, g2, be2, rm2, rv2, eps=1e-5):
    """Pure-JAX f32 reference (NCHW), mirrors PyTorch eval-mode forward."""
    def conv(x, w):
        return lax.conv_general_dilated(
            x, w, window_strides=(1, 1), padding=((1, 1), (1, 1)),
            dimension_numbers=("NCHW", "OIHW", "NCHW"))

    def bn(x, g, b, m, v):
        g = g.reshape(1, -1, 1, 1); b = b.reshape(1, -1, 1, 1)
        m = m.reshape(1, -1, 1, 1); v = v.reshape(1, -1, 1, 1)
        return (x - m) / jnp.sqrt(v + eps) * g + b

    out = conv(x, w1)
    out = jnp.maximum(bn(out, g1, be1, rm1, rv1), 0.0)
    out = conv(out, w2)
    out = bn(out, g2, be2, rm2, rv2)
    return jnp.maximum(out + x, 0.0)


if __name__ == "__main__":
    # stride=1, downsample=None requires in_planes == planes.  W*C = 128 keeps
    # the folded width axis lane-dense; N=8 exercises image batching (NB=4
    # images per grid step, 2 parallel grid steps -> both v7x TCs busy).
    N, C, H, W = 8, 8, 16, 16
    key = jax.random.PRNGKey(0)
    ks = jax.random.split(key, 12)

    x = jax.random.normal(ks[0], (N, C, H, W), jnp.float32)
    w1 = jax.random.normal(ks[1], (C, C, 3, 3), jnp.float32) * 0.1   # conv1 (OIHW)
    w2 = jax.random.normal(ks[2], (C, C, 3, 3), jnp.float32) * 0.1   # conv2 (OIHW)
    g1 = 1.0 + 0.1 * jax.random.normal(ks[3], (C,), jnp.float32)
    be1 = 0.1 * jax.random.normal(ks[4], (C,), jnp.float32)
    rm1 = 0.1 * jax.random.normal(ks[5], (C,), jnp.float32)
    rv1 = 1.0 + 0.1 * jax.random.uniform(ks[6], (C,), jnp.float32)
    g2 = 1.0 + 0.1 * jax.random.normal(ks[7], (C,), jnp.float32)
    be2 = 0.1 * jax.random.normal(ks[8], (C,), jnp.float32)
    rm2 = 0.1 * jax.random.normal(ks[9], (C,), jnp.float32)
    rv2 = 1.0 + 0.1 * jax.random.uniform(ks[10], (C,), jnp.float32)

    out = bisic_block_pallas(x, w1, w2, g1, be1, rm1, rv1, g2, be2, rm2, rv2)
    out = jax.block_until_ready(out)

    ref = _reference(x, w1, w2, g1, be1, rm1, rv1, g2, be2, rm2, rv2)
    assert out.shape == (N, C, H, W)
    max_diff = float(jnp.max(jnp.abs(out - ref)))
    # bf16 MXU operands, bf16 intermediate and bf16 skip-connection vs an f32
    # reference -> loosened tolerance.
    assert jnp.allclose(out, ref, atol=5e-2, rtol=5e-2), max_diff

    print("KERNEL_OK")
</pallas_src>

<mosaic_0001>
module attributes {stable_mosaic.version = 11 : i64} {
  func.func @_bisic_block_kernel(%arg0: i32, %arg1: memref<72x128xbf16, #tpu.memory_space<vmem>>, %arg2: memref<3x128x128xbf16, #tpu.memory_space<vmem>>, %arg3: memref<3x128x128xbf16, #tpu.memory_space<vmem>>, %arg4: memref<1x128xf32, #tpu.memory_space<vmem>>, %arg5: memref<1x128xf32, #tpu.memory_space<vmem>>, %arg6: memref<64x128xf32, #tpu.memory_space<vmem>>, %arg7: memref<72x128xbf16, #tpu.memory_space<vmem>>) attributes {dimension_semantics = [#tpu.dimension_semantics<parallel>], iteration_bounds = array<i64: 2>, scalar_prefetch = 0 : i64, scratch_operands = 1 : i64, tpu.core_type = #tpu.core_type<tc>, window_params = [{transform_indices = @transform_0, window_bounds = array<i64: 72, 128>}, {pipeline_mode = #tpu.pipeline_mode<synchronous>, transform_indices = @transform_1, window_bounds = array<i64: 3, 128, 128>}, {pipeline_mode = #tpu.pipeline_mode<synchronous>, transform_indices = @transform_2, window_bounds = array<i64: 3, 128, 128>}, {pipeline_mode = #tpu.pipeline_mode<synchronous>, transform_indices = @transform_3, window_bounds = array<i64: 1, 128>}, {pipeline_mode = #tpu.pipeline_mode<synchronous>, transform_indices = @transform_4, window_bounds = array<i64: 1, 128>}, {transform_indices = @transform_5, window_bounds = array<i64: 64, 128>}]} {
    %c0 = arith.constant 0 : index
    %c0_0 = arith.constant 0 : index
    %0 = vector.load %arg1[%c0, %c0_0] : memref<72x128xbf16, #tpu.memory_space<vmem>>, vector<72x128xbf16>
    %1 = vector.extract_strided_slice %0 {offsets = [0, 0], sizes = [70, 128], strides = [1, 1]} : vector<72x128xbf16> to vector<70x128xbf16>
    %c0_1 = arith.constant 0 : index
    %c0_2 = arith.constant 0 : index
    %c0_3 = arith.constant 0 : index
    %2 = vector.load %arg2[%c0_1, %c0_2, %c0_3] : memref<3x128x128xbf16, #tpu.memory_space<vmem>>, vector<1x128x128xbf16>
    %3 = vector.shape_cast %2 : vector<1x128x128xbf16> to vector<128x128xbf16>
    %cst = arith.constant dense<0.000000e+00> : vector<70x128xf32>
    %4 = tpu.matmul %1, %3, %cst {dimension_numbers = #tpu.dot_dimension_numbers<[1], [0], [0], [1], [0, 0, 1, 1], [], []>} : vector<70x128xbf16>, vector<128x128xbf16>, vector<70x128xf32> -> vector<70x128xf32>
    %5 = vector.extract_strided_slice %0 {offsets = [1, 0], sizes = [70, 128], strides = [1, 1]} : vector<72x128xbf16> to vector<70x128xbf16>
    %c1 = arith.constant 1 : index
    %c0_4 = arith.constant 0 : index
    %c0_5 = arith.constant 0 : index
    %6 = vector.load %arg2[%c1, %c0_4, %c0_5] : memref<3x128x128xbf16, #tpu.memory_space<vmem>>, vector<1x128x128xbf16>
    %7 = vector.shape_cast %6 : vector<1x128x128xbf16> to vector<128x128xbf16>
    %cst_6 = arith.constant dense<0.000000e+00> : vector<70x128xf32>
    %8 = tpu.matmul %5, %7, %cst_6 {dimension_numbers = #tpu.dot_dimension_numbers<[1], [0], [0], [1], [0, 0, 1, 1], [], []>} : vector<70x128xbf16>, vector<128x128xbf16>, vector<70x128xf32> -> vector<70x128xf32>
    %9 = arith.addf %4, %8 : vector<70x128xf32>
    %10 = vector.extract_strided_slice %0 {offsets = [2, 0], sizes = [70, 128], strides = [1, 1]} : vector<72x128xbf16> to vector<70x128xbf16>
    %c2 = arith.constant 2 : index
    %c0_7 = arith.constant 0 : index
    %c0_8 = arith.constant 0 : index
    %11 = vector.load %arg2[%c2, %c0_7, %c0_8] : memref<3x128x128xbf16, #tpu.memory_space<vmem>>, vector<1x128x128xbf16>
    %12 = vector.shape_cast %11 : vector<1x128x128xbf16> to vector<128x128xbf16>
    %cst_9 = arith.constant dense<0.000000e+00> : vector<70x128xf32>
    %13 = tpu.matmul %10, %12, %cst_9 {dimension_numbers = #tpu.dot_dimension_numbers<[1], [0], [0], [1], [0, 0, 1, 1], [], []>} : vector<70x128xbf16>, vector<128x128xbf16>, vector<70x128xf32> -> vector<70x128xf32>
    %14 = arith.addf %9, %13 : vector<70x128xf32>
    %c0_10 = arith.constant 0 : index
    %c0_11 = arith.constant 0 : index
    %15 = vector.load %arg4[%c0_10, %c0_11] : memref<1x128xf32, #tpu.memory_space<vmem>>, vector<1x128xf32>
    %16 = vector.shape_cast %15 : vector<1x128xf32> to vector<128xf32>
    %17 = vector.shape_cast %16 : vector<128xf32> to vector<1x128xf32>
    %18 = vector.broadcast %17 : vector<1x128xf32> to vector<70x128xf32>
    %19 = arith.addf %14, %18 : vector<70x128xf32>
    %cst_12 = arith.constant 0.000000e+00 : f32
    %20 = vector.broadcast %cst_12 : f32 to vector<70x128xf32>
    %21 = arith.maximumf %19, %20 : vector<70x128xf32>
    %22 = arith.truncf %21 : vector<70x128xf32> to vector<70x128xbf16>
    %c1_13 = arith.constant 1 : index
    %c0_14 = arith.constant 0 : index
    %23 = vector.load %arg7[%c1_13, %c0_14] : memref<72x128xbf16, #tpu.memory_space<vmem>>, vector<70x128xbf16>
    tpu.vector_store %arg7[%c1_13, %c0_14], %22 {strides = array<i32>} : memref<72x128xbf16, #tpu.memory_space<vmem>>, vector<70x128xbf16>,
    %cst_15 = arith.constant 0.000000e+00 : bf16
    %24 = vector.broadcast %cst_15 : bf16 to vector<1x128xbf16>
    %c0_16 = arith.constant 0 : index
    %c0_17 = arith.constant 0 : index
    %25 = vector.load %arg7[%c0_16, %c0_17] : memref<72x128xbf16, #tpu.memory_space<vmem>>, vector<1x128xbf16>
    tpu.vector_store %arg7[%c0_16, %c0_17], %24 {strides = array<i32>} : memref<72x128xbf16, #tpu.memory_space<vmem>>, vector<1x128xbf16>,
    %c17 = arith.constant 17 : index
    %c0_18 = arith.constant 0 : index
    %26 = vector.load %arg7[%c17, %c0_18] : memref<72x128xbf16, #tpu.memory_space<vmem>>, vector<1x128xbf16>
    tpu.vector_store %arg7[%c17, %c0_18], %24 {strides = array<i32>} : memref<72x128xbf16, #tpu.memory_space<vmem>>, vector<1x128xbf16>,
    %c18 = arith.constant 18 : index
    %c0_19 = arith.constant 0 : index
    %27 = vector.load %arg7[%c18, %c0_19] : memref<72x128xbf16, #tpu.memory_space<vmem>>, vector<1x128xbf16>
    tpu.vector_store %arg7[%c18, %c0_19], %24 {strides = array<i32>} : memref<72x128xbf16, #tpu.memory_space<vmem>>, vector<1x128xbf16>,
    %c35 = arith.constant 35 : index
    %c0_20 = arith.constant 0 : index
    %28 = vector.load %arg7[%c35, %c0_20] : memref<72x128xbf16, #tpu.memory_space<vmem>>, vector<1x128xbf16>
    tpu.vector_store %arg7[%c35, %c0_20], %24 {strides = array<i32>} : memref<72x128xbf16, #tpu.memory_space<vmem>>, vector<1x128xbf16>,
    %c36 = arith.constant 36 : index
    %c0_21 = arith.constant 0 : index
    %29 = vector.load %arg7[%c36, %c0_21] : memref<72x128xbf16, #tpu.memory_space<vmem>>, vector<1x128xbf16>
    tpu.vector_store %arg7[%c36, %c0_21], %24 {strides = array<i32>} : memref<72x128xbf16, #tpu.memory_space<vmem>>, vector<1x128xbf16>,
    %c53 = arith.constant 53 : index
    %c0_22 = arith.constant 0 : index
    %30 = vector.load %arg7[%c53, %c0_22] : memref<72x128xbf16, #tpu.memory_space<vmem>>, vector<1x128xbf16>
    tpu.vector_store %arg7[%c53, %c0_22], %24 {strides = array<i32>} : memref<72x128xbf16, #tpu.memory_space<vmem>>, vector<1x128xbf16>,
    %c54 = arith.constant 54 : index
    %c0_23 = arith.constant 0 : index
    %31 = vector.load %arg7[%c54, %c0_23] : memref<72x128xbf16, #tpu.memory_space<vmem>>, vector<1x128xbf16>
    tpu.vector_store %arg7[%c54, %c0_23], %24 {strides = array<i32>} : memref<72x128xbf16, #tpu.memory_space<vmem>>, vector<1x128xbf16>,
    %c71 = arith.constant 71 : index
    %c0_24 = arith.constant 0 : index
    %32 = vector.load %arg7[%c71, %c0_24] : memref<72x128xbf16, #tpu.memory_space<vmem>>, vector<1x128xbf16>
    tpu.vector_store %arg7[%c71, %c0_24], %24 {strides = array<i32>} : memref<72x128xbf16, #tpu.memory_space<vmem>>, vector<1x128xbf16>,
    %c0_25 = arith.constant 0 : index
    %c0_26 = arith.constant 0 : index
    %33 = vector.load %arg7[%c0_25, %c0_26] : memref<72x128xbf16, #tpu.memory_space<vmem>>, vector<72x128xbf16>
    %34 = vector.extract_strided_slice %33 {offsets = [0, 0], sizes = [70, 128], strides = [1, 1]} : vector<72x128xbf16> to vector<70x128xbf16>
    %c0_27 = arith.constant 0 : index
    %c0_28 = arith.constant 0 : index
    %c0_29 = arith.constant 0 : index
    %35 = vector.load %arg3[%c0_27, %c0_28, %c0_29] : memref<3x128x128xbf16, #tpu.memory_space<vmem>>, vector<1x128x128xbf16>
    %36 = vector.shape_cast %35 : vector<1x128x128xbf16> to vector<128x128xbf16>
    %cst_30 = arith.constant dense<0.000000e+00> : vector<70x128xf32>
    %37 = tpu.matmul %34, %36, %cst_30 {dimension_numbers = #tpu.dot_dimension_numbers<[1], [0], [0], [1], [0, 0, 1, 1], [], []>} : vector<70x128xbf16>, vector<128x128xbf16>, vector<70x128xf32> -> vector<70x128xf32>
    %38 = vector.extract_strided_slice %33 {offsets = [1, 0], sizes = [70, 128], strides = [1, 1]} : vector<72x128xbf16> to vector<70x128xbf16>
    %c1_31 = arith.constant 1 : index
    %c0_32 = arith.constant 0 : index
    %c0_33 = arith.constant 0 : index
    %39 = vector.load %arg3[%c1_31, %c0_32, %c0_33] : memref<3x128x128xbf16, #tpu.memory_space<vmem>>, vector<1x128x128xbf16>
    %40 = vector.shape_cast %39 : vector<1x128x128xbf16> to vector<128x128xbf16>
    %cst_34 = arith.constant dense<0.000000e+00> : vector<70x128xf32>
    %41 = tpu.matmul %38, %40, %cst_34 {dimension_numbers = #tpu.dot_dimension_numbers<[1], [0], [0], [1], [0, 0, 1, 1], [], []>} : vector<70x128xbf16>, vector<128x128xbf16>, vector<70x128xf32> -> vector<70x128xf32>
    %42 = arith.addf %37, %41 : vector<70x128xf32>
    %43 = vector.extract_strided_slice %33 {offsets = [2, 0], sizes = [70, 128], strides = [1, 1]} : vector<72x128xbf16> to vector<70x128xbf16>
    %c2_35 = arith.constant 2 : index
    %c0_36 = arith.constant 0 : index
    %c0_37 = arith.constant 0 : index
    %44 = vector.load %arg3[%c2_35, %c0_36, %c0_37] : memref<3x128x128xbf16, #tpu.memory_space<vmem>>, vector<1x128x128xbf16>
    %45 = vector.shape_cast %44 : vector<1x128x128xbf16> to vector<128x128xbf16>
    %cst_38 = arith.constant dense<0.000000e+00> : vector<70x128xf32>
    %46 = tpu.matmul %43, %45, %cst_38 {dimension_numbers = #tpu.dot_dimension_numbers<[1], [0], [0], [1], [0, 0, 1, 1], [], []>} : vector<70x128xbf16>, vector<128x128xbf16>, vector<70x128xf32> -> vector<70x128xf32>
    %47 = arith.addf %42, %46 : vector<70x128xf32>
    %c0_39 = arith.constant 0 : index
    %c0_40 = arith.constant 0 : index
    %48 = vector.load %arg5[%c0_39, %c0_40] : memref<1x128xf32, #tpu.memory_space<vmem>>, vector<1x128xf32>
    %49 = vector.shape_cast %48 : vector<1x128xf32> to vector<128xf32>
    %50 = vector.shape_cast %49 : vector<128xf32> to vector<1x128xf32>
    %51 = vector.broadcast %50 : vector<1x128xf32> to vector<70x128xf32>
    %52 = arith.addf %47, %51 : vector<70x128xf32>
    %53 = vector.extract_strided_slice %0 {offsets = [1, 0], sizes = [70, 128], strides = [1, 1]} : vector<72x128xbf16> to vector<70x128xbf16>
    %54 = arith.extf %53 : vector<70x128xbf16> to vector<70x128xf32>
    %55 = arith.addf %52, %54 : vector<70x128xf32>
    %cst_41 = arith.constant 0.000000e+00 : f32
    %56 = vector.broadcast %cst_41 : f32 to vector<70x128xf32>
    %57 = arith.maximumf %55, %56 : vector<70x128xf32>
    %58 = vector.extract_strided_slice %57 {offsets = [0, 0], sizes = [16, 128], strides = [1, 1]} : vector<70x128xf32> to vector<16x128xf32>
    %c0_42 = arith.constant 0 : index
    %c0_43 = arith.constant 0 : index
    %59 = vector.load %arg6[%c0_42, %c0_43] : memref<64x128xf32, #tpu.memory_space<vmem>>, vector<16x128xf32>
    tpu.vector_store %arg6[%c0_42, %c0_43], %58 {strides = array<i32>} : memref<64x128xf32, #tpu.memory_space<vmem>>, vector<16x128xf32>,
    %60 = vector.extract_strided_slice %57 {offsets = [18, 0], sizes = [16, 128], strides = [1, 1]} : vector<70x128xf32> to vector<16x128xf32>
    %c16 = arith.constant 16 : index
    %c0_44 = arith.constant 0 : index
    %61 = vector.load %arg6[%c16, %c0_44] : memref<64x128xf32, #tpu.memory_space<vmem>>, vector<16x128xf32>
    tpu.vector_store %arg6[%c16, %c0_44], %60 {strides = array<i32>} : memref<64x128xf32, #tpu.memory_space<vmem>>, vector<16x128xf32>,
    %62 = vector.extract_strided_slice %57 {offsets = [36, 0], sizes = [16, 128], strides = [1, 1]} : vector<70x128xf32> to vector<16x128xf32>
    %c32 = arith.constant 32 : index
    %c0_45 = arith.constant 0 : index
    %63 = vector.load %arg6[%c32, %c0_45] : memref<64x128xf32, #tpu.memory_space<vmem>>, vector<16x128xf32>
    tpu.vector_store %arg6[%c32, %c0_45], %62 {strides = array<i32>} : memref<64x128xf32, #tpu.memory_space<vmem>>, vector<16x128xf32>,
    %64 = vector.extract_strided_slice %57 {offsets = [54, 0], sizes = [16, 128], strides = [1, 1]} : vector<70x128xf32> to vector<16x128xf32>
    %c48 = arith.constant 48 : index
    %c0_46 = arith.constant 0 : index
    %65 = vector.load %arg6[%c48, %c0_46] : memref<64x128xf32, #tpu.memory_space<vmem>>, vector<16x128xf32>
    tpu.vector_store %arg6[%c48, %c0_46], %64 {strides = array<i32>} : memref<64x128xf32, #tpu.memory_space<vmem>>, vector<16x128xf32>,
    return
  }
  func.func @transform_0(%arg0: i32) -> (i32, i32) {
    %c0_i32 = arith.constant 0 : i32
    %c0_i32_0 = arith.constant 0 : i32
    return %arg0, %c0_i32 : i32, i32
  }
  func.func @transform_1(%arg0: i32) -> (i32, i32, i32) {
    %c0_i32 = arith.constant 0 : i32
    %c0_i32_0 = arith.constant 0 : i32
    %c0_i32_1 = arith.constant 0 : i32
    %c0_i32_2 = arith.constant 0 : i32
    return %c0_i32, %c0_i32_0, %c0_i32_1 : i32, i32, i32
  }
  func.func @transform_2(%arg0: i32) -> (i32, i32, i32) {
    %c0_i32 = arith.constant 0 : i32
    %c0_i32_0 = arith.constant 0 : i32
    %c0_i32_1 = arith.constant 0 : i32
    %c0_i32_2 = arith.constant 0 : i32
    return %c0_i32, %c0_i32_0, %c0_i32_1 : i32, i32, i32
  }
  func.func @transform_3(%arg0: i32) -> (i32, i32) {
    %c0_i32 = arith.constant 0 : i32
    %c0_i32_0 = arith.constant 0 : i32
    %c0_i32_1 = arith.constant 0 : i32
    return %c0_i32, %c0_i32_0 : i32, i32
  }
  func.func @transform_4(%arg0: i32) -> (i32, i32) {
    %c0_i32 = arith.constant 0 : i32
    %c0_i32_0 = arith.constant 0 : i32
    %c0_i32_1 = arith.constant 0 : i32
    return %c0_i32, %c0_i32_0 : i32, i32
  }
  func.func @transform_5(%arg0: i32) -> (i32, i32) {
    %c0_i32 = arith.constant 0 : i32
    %c0_i32_0 = arith.constant 0 : i32
    return %arg0, %c0_i32 : i32, i32
  }
}

</mosaic_0001>

<bundles_post_ra>
// kernel: tpu_custom_call.1
= control target key start
LH: loop header
LB: loop body
LE: loop exit
PB: predicated region body
PF: predicated region fallthrough
CT: control target
= control target key end

     0   :  { %10 = vsyncpa [#allocation4], 0  ;;  %s3023_s0 = inlined_call_operand.hbm [shape: bf16[144,128], index: 0, kind: input, shape index: {}]   ;;  %s3024_s1 = inlined_call_operand.hbm [shape: bf16[3,128,128], index: 1, kind: input, shape index: {}]   ;;  %s3025_s2 = inlined_call_operand.hbm [shape: bf16[3,128,128], index: 2, kind: input, shape index: {}]   ;;  %s3026_s3 = inlined_call_operand.vmem [shape: f32[1,128], index: 3, kind: input, shape index: {}]   ;;  %s3027_s4 = inlined_call_operand.vmem [shape: f32[1,128], index: 4, kind: input, shape index: {}]   ;;  %s3028_s5 = inlined_call_operand.hbm [shape: f32[128,128], index: 5, kind: output, shape index: {}]  }
   0x1   :  { %12 = vsyncpa [#allocation4 + $0x1], 0 }
   0x2   :  { %13 = vsyncpa [#allocation7], 0 }
   0x3   :  { %14 = vsyncpa [#allocation5], 0 }
   0x4   :  { %16 = vsyncpa [#allocation5 + $0x1], 0  ;;  %s2433_s18 = smov 0   ;;  %s2435_s19 = smov 0  }
   0x5   :  { %s2437_s20 = smov 0   ;;  %s2439_s21 = smov 0  }
   0x6 LB: > { %s2454_s22 = sadd.s32 4294967295, %s2391_s21   ;;  %s1704_s23 = sadd.s32 4294967294, %s2391_s21   ;;  %s2391_s21 = sphi %s2439_s21, %s3068_s21   ;;  %s2387_s20 = sphi %s2437_s20, %s3067_s20   ;;  %s2383_s19 = sphi %s2435_s19, %s3066_s19   ;;  %s2379_s18 = sphi %s2433_s18, %s3065_s18  }
   0x7   : > { %p42_p0 = scmp.ne.s32.totalorder %s2383_s19, %s2379_s18  ;;  %p3029_p1 = scmp.eq.s32.totalorder %s2454_s22, 0 }
   0x8   : > { %p156_p3 = scmp.eq.s32.totalorder %s1704_s23, 1  ;;  %p1705_p5 = scmp.ge.s32.totalorder %s2391_s21, 1 }
   0x9   : > { %p2463_p4 = por %p3029_p1, %p42_p0  ;;  %p163_p7 = scmp.lt.s32.totalorder %s2391_s21, 3 }
   0xa   : > { %p2468_p6 = por %p156_p3, %p42_p0  ;;  %s2393_s27 = smov [#allocation6]  }
   0xb   : > { %s3033_s24 = scalar_select %p2463_p4, 1, 0 }
   0xc   : > { %s3034_s25 = scalar_select %p2468_p6, 1, 0 }
   0xd   : > { %p2473_p8 = pnand %p1705_p5, %p163_p7  ;;  %s175_s28 = sshll.u32 %s2393_s27, 4  ;;  %s2477_s28 = int_to_ptr.vmem [resolvable:$true] %s175_s28 }
   0xe   : > { %s2394_s30 = smov [#allocation8]   ;;  %s2235_s9 = scalar_lea.hbm %s3024_s1, 3072 }
   0xf   : > { %p2107_p9 = pneg %p2473_p8  ;;  %s188_s6 = sshll.u32 %s2394_s30, 4  ;;  %s2488_s6 = int_to_ptr.vmem [resolvable:$true] %s188_s6 }
  0x10   : > { %p2236_p12 = scmp.ne.s32.totalorder %s3024_s1, %s2235_s9  ;;  %p2242_p5 = scmp.lt.u32.totalorder %s2235_s9, %s3024_s1 }
  0x11   : > { %p2484_p11 = pnand %p2107_p9, %p3029_p1 }
  0x13   : > { %p2237_p13 = pneg %p2484_p11 }
  0x15   : > { %p2238_p0 = pnand %p2237_p13, %p2236_p12 }
  0x17   : > { %p2239_p3 = pneg %p2238_p0 }
  0x19   : > { %p2244_p7 = pnand %p2242_p5, %p2239_p3 }
  0x1b   : > { %2247 = shalt.err (!%p2244_p7)
}
  0x1c   : > { %s2248_s14 = scalar_lea.vmem %s2477_s28, 3072  ;;  %p2256_p2 = scmp.lt.s32.totalorder %s2477_s28, %s2477_s28 }
  0x1d   : > { %p2249_p9 = scmp.ne.s32.totalorder %s2477_s28, %s2248_s14  ;;  %p2257_p12 = scmp.lt.s32.totalorder %s2248_s14, %s2248_s14 }
  0x1f   : > { %p2251_p10 = pnand %p2249_p9, %p2237_p13  ;;  %p2258_p0 = por %p2257_p12, %p2256_p2 }
  0x21   : > { %p2252_p1 = pneg %p2251_p10 }
  0x23   : > { %p2259_p6 = pnand %p2258_p0, %p2252_p1 }
  0x25   : > { %2262 = shalt.err (!%p2259_p6)
}
  0x26   : > { %s3030_s15 = smov 64   ;;  %s2396_s16 = smov 4  }
  0x27   : > { %2110 = dma.hbm_to_vmem [thread:$0]  (!%p2484_p11), %s3024_s1, 3072, %s2477_s28, [#allocation7], %s3030_s15, %s3030_s15, %s2396_s16  }
  0x28   : > { %s2263_s7 = scalar_lea.hbm %s3025_s2, 3072 }
  0x29   : > { %p2264_p1 = scmp.ne.s32.totalorder %s3025_s2, %s2263_s7  ;;  %p2270_p10 = scmp.lt.u32.totalorder %s2263_s7, %s3025_s2 }
  0x2b   : > { %p2266_p2 = pnand %p2264_p1, %p2237_p13 }
  0x2d   : > { %p2267_p6 = pneg %p2266_p2 }
  0x2f   : > { %p2272_p3 = pnand %p2270_p10, %p2267_p6 }
  0x31   : > { %2275 = shalt.err (!%p2272_p3)
}
  0x32   : > { %s2276_s28 = scalar_lea.vmem %s2488_s6, 3072  ;;  %p2284_p12 = scmp.lt.s32.totalorder %s2488_s6, %s2488_s6 }
  0x33   : > { %p2277_p5 = scmp.ne.s32.totalorder %s2488_s6, %s2276_s28  ;;  %p2285_p0 = scmp.lt.s32.totalorder %s2276_s28, %s2276_s28 }
  0x35   : > { %p2279_p7 = pnand %p2277_p5, %p2237_p13  ;;  %p2286_p1 = por %p2285_p0, %p2284_p12 }
  0x37   : > { %p2280_p9 = pneg %p2279_p7 }
  0x39   : > { %p2287_p2 = pnand %p2286_p1, %p2280_p9 }
  0x3b   : > { %2290 = shalt.err (!%p2287_p2)
}
  0x3c   : > { %2113 = dma.hbm_to_vmem [thread:$0]  (!%p2484_p11), %s3025_s2, 3072, %s2488_s6, [#allocation7], %s3030_s15, %s3030_s15, %s2396_s16  }
  0x3d   : > { %s2549_s29 = sadd.s32 1, %s2391_s21   ;;  %s29_s14 = sadd.s32 1, %s2387_s20 }
  0x3e   : > { %s26_s17 = ssub.s32 %s2391_s21, %s2549_s29  ;;  %p36_p13 = scmp.ne.s32.totalorder %s2387_s20, %s2383_s19 }
  0x3f   : > { %p27_p6 = scmp.eq.s32.totalorder %s26_s17, 0  ;;  %p37_p10 = scmp.eq.s32.totalorder %s2391_s21, 0 }
  0x40   : > { %p3037_p3 = scmp.eq.s32.totalorder %s2454_s22, 1  ;;  %p2124_p7 = scmp.lt.s32.totalorder %s2391_s21, 2 }
  0x41   : > { %s2565_s27 = scalar_select %p27_p6, %s2387_s20, %s29_s14  }
  0x42   : > { %p2559_p5 = por %p3037_p3, %p36_p13  ;;  %p38_p9 = por %p37_p10, %p36_p13 }
  0x43   : > { %s208_s30 = sand.u32 1, %s2387_s20   ;;  %s1788_s6 = smul.u32 576, %s2391_s21 }
  0x44   : > { %s3038_s23 = scalar_select %p2559_p5, 1, 0 }
  0x45   : > { %s2093_s7 = smul.u32 36, %s208_s30  ;;  %p2569_p11 = pnand %p2124_p7, %p38_p9 }
  0x46   : > { %s2576_s11 = scalar_lea.hbm %s3023_s0, %s1788_s6  ;;  %s2580_s13 = scalar_lea.sflag [#allocation4], %s208_s30 }
  0x47   : > { %s212_s28 = scalar_lea.vmem [#allocation3], %s2093_s7  ;;  %s2291_s14 = scalar_lea.hbm %s2576_s11, 576 }
  0x48   : > { %s219_s12 = sshll.u32 %s212_s28, 4  ;;  %p2292_p12 = scmp.ne.s32.totalorder %s2576_s11, %s2291_s14  ;;  %s2578_s12 = int_to_ptr.vmem [resolvable:$true] %s219_s12 }
  0x49   : > { %p2293_p0 = pneg %p2569_p11  ;;  %s2296_s9 = scalar_lea.hbm %s3023_s0, 1152 }
  0x4a   : > { %p2297_p13 = scmp.lt.u32.totalorder %s2576_s11, %s3023_s0  ;;  %p2298_p6 = scmp.lt.u32.totalorder %s2296_s9, %s2291_s14 }
  0x4b   : > { %p2294_p1 = pnand %p2293_p0, %p2292_p12  ;;  %p2300_p3 = scmp.lt.u32.totalorder %s2291_s14, %s2576_s11 }
  0x4c   : > { %p2299_p10 = por %p2298_p6, %p2297_p13 }
  0x4d   : > { %p2295_p2 = pneg %p2294_p1 }
  0x4e   : > { %p2301_p7 = por %p2300_p3, %p2299_p10 }
  0x50   : > { %p2302_p9 = pnand %p2301_p7, %p2295_p2 }
  0x52   : > { %2305 = shalt.err (!%p2302_p9)
}
  0x53   : > { %s2306_s30 = scalar_lea.vmem %s2578_s12, 576  ;;  %s2397_s7 = smov [#allocation3]  }
  0x54   : > { %p2307_p12 = scmp.ne.s32.totalorder %s2578_s12, %s2306_s30  ;;  %s2311_s28 = sshll.u32 %s2397_s7, 4  ;;  %s2312_s28 = int_to_ptr.vmem [resolvable:$false] %s2311_s28 }
  0x55   : > { %s2313_s15 = scalar_lea.vmem %s2312_s28, 1152  ;;  %p2314_p4 = scmp.lt.s32.totalorder %s2578_s12, %s2312_s28 }
  0x56   : > { %p2309_p1 = pnand %p2307_p12, %p2293_p0  ;;  %p2315_p13 = scmp.lt.s32.totalorder %s2313_s15, %s2306_s30 }
  0x58   : > { %p2310_p5 = pneg %p2309_p1  ;;  %p2316_p6 = por %p2315_p13, %p2314_p4 }
  0x5a   : > { %p2317_p10 = pnand %p2316_p6, %p2310_p5 }
  0x5c   : > { %2320 = shalt.err (!%p2317_p10)
}
  0x5d   : > { %s3040_s14 = smov 64   ;;  %231 = sbr.rel (%p2473_p8) target bundleno = 742 (0x2e6), region = 40 }
  0x5e   : > { %2117 = dma.hbm_to_vmem [thread:$0]  (!%p2569_p11), %s2576_s11, 576, %s2578_s12, %s2580_s13, %s3040_s14, %s3040_s14, %s2396_s16  }
  0x5f   : > { %s2614_s17 = sand.u32 (!%p2473_p8), 1, %s2383_s19   ;;  %p3041_p4 = scmp.ne.s32.totalorder (!%p2473_p8), %s3033_s24, 0 }
  0x60   : > { %s2094_s6 = smul.u32 (!%p2473_p8), 36, %s2614_s17  ;;  %s234_s9 = scalar_lea.sflag (!%p2473_p8), [#allocation4], %s2614_s17 }
  0x62   : > { %s2618_s10 = scalar_lea.vmem (!%p2473_p8), [#allocation3], %s2094_s6 }
  0x64   : > { %2366 = dma.done.wait (%p3041_p4), %s234_s9, 576  }
  0x65   : > { %2368 = vsyncadd (%p3041_p4), %s234_s9, 4294966720  ;;  %p3042_p5 = scmp.eq.s32.totalorder %s2454_s22, 0 }
  0x67   : > { %2370 = dma.done.wait (%p3042_p5), [#allocation7], 6144   ;;  %p3043_p8 = pmov %p3042_p5 }
  0x68   : > { %v2398_v0 = vmov 0.0   ;;  %vm2399_vm0 = vmmov 0   ;;  %v2168_v1 = vld [vmem:[#allocation6 + $0x40] sm:$0xff]   ;;  %v2170_v3 = vld [vmem:[#allocation6 + $0x48] sm:$0xff]   ;;  %v2172_v5 = vld [vmem:[#allocation6 + $0x50] sm:$0xff]   ;;  %vm647_vm2 = vcmask 1046528  }
  0x69   : > { %2372 = vsyncadd (%p3043_p8), [#allocation7], 4294961152  ;;  %1877 = vmatprep.subr.bf16.mxu0 %v2398_v0  ;;  %1913 = vmatprep.subr.bf16.mxu1 %v2398_v0  ;;  %v2169_v2 = vld [vmem:[#allocation6] sm:$0xff]   ;;  %v2171_v4 = vld [vmem:[#allocation6 + $0x8] sm:$0xff]   ;;  %vm340_vm1 = vsmask.f32 7424 }
  0x6a   : > { %1893 = vmatprep.mubr.msk.bf16.mxu0 %vm2399_vm0, %v2398_v0  ;;  %1929 = vmatprep.mubr.msk.bf16.mxu1 %vm2399_vm0, %v2398_v0  ;;  %v2173_v6 = vld [vmem:[#allocation6 + $0x10] sm:$0xff]   ;;  %v2174_v7 = vld [vmem:[#allocation6 + $0x58] sm:$0xff]   ;;  %v2176_v9 = vld [vmem:[#allocation6 + $0x60] sm:$0xff]   ;;  %vm935_vm3 = vcmask 1043456   ;;  %vm936_vm4 = vsmask.f32 7938 }
  0x6b   : > { %1878 = vmatpush3.bf16.msra.mxu0 %v2168_v1  ;;  %1914 = vmatpush3.bf16.msra.mxu1 %v2169_v2  ;;  %v2175_v8 = vld [vmem:[#allocation6 + $0x18] sm:$0xff]   ;;  %v2177_v10 = vld [vmem:[#allocation6 + $0x20] sm:$0xff]   ;;  %v2178_v13 = vld [vmem:[#allocation6 + $0x68] sm:$0xff]   ;;  %vm844_vm5 = vsmask.f32 256  ;;  %vm953_vm9 = vcmask 1040384  }
  0x6c   : > { %1879 = vmatprep.subr.bf16.mxu0 %v2398_v0  ;;  %1915 = vmatprep.subr.bf16.mxu1 %v2398_v0  ;;  %v2643_v11 = vld [vmem:[%s2618_s10] sm:$0xff]   ;;  %v2646_v12 = vld [vmem:[%s2618_s10 + $0x8] sm:$0xff]   ;;  %v2649_v14 = vld [vmem:[%s2618_s10 + $0x10] sm:$0xff]   ;;  %vm845_vm6 = vsmask.f32 4368  ;;  %vm962_vm11 = vcmask 1041409  }
  0x6d   : > { %v2179_v15 = vld [vmem:[#allocation6 + $0x28] sm:$0xff]   ;;  %v344_v16 = vshll.u32 %v2643_v11, 16  ;;  %v2655_v17 = vld [vmem:[%s2618_s10 + $0x18] sm:$0xff]   ;;  %v342_v19 = vshrl.u32 %v2643_v11, 16  ;;  %v349_v21 = vshll.u32 %v2646_v12, 16  ;;  %v357_v23 = vshll.u32 %v2649_v14, 16  ;;  %vm937_vm7 = vmand %vm935_vm3, %vm936_vm4 }
  0x6e   : > { %v2180_v18 = vld [vmem:[#allocation6 + $0x70] sm:$0xff]   ;;  %v365_v24 = vshll.u32 %v2655_v17, 16  ;;  %v2182_v25 = vld [vmem:[#allocation6 + $0x78] sm:$0xff]   ;;  %v2186_v29 = vld [vmem:[#allocation6 + $0x80] sm:$0xff]   ;;  %v353_v30 = vshrl.u32 %v2646_v12, 16  ;;  %v361_v32 = vshrl.u32 %v2649_v14, 16 }
  0x6f   : > { %1880 = vmatpush3.bf16.msra.mxu0 %v2170_v3  ;;  %1916 = vmatpush3.bf16.msra.mxu1 %v2171_v4  ;;  %v346_v20 = vrot.slane %v344_v16, 1  ;;  %v2181_v22 = vld [vmem:[#allocation6 + $0x30] sm:$0xff]   ;;  %v351_v27 = vrot.slane %v349_v21, 1  ;;  %v2183_v28 = vld [vmem:[#allocation6 + $0x38] sm:$0xff]   ;;  %v359_v31 = vrot.slane %v357_v23, 1  ;;  %v2187_v35 = vld [vmem:[#allocation6 + $0x88] sm:$0xff]  }
  0x70   : > { %1881 = vmatprep.subr.bf16.mxu0 %v2398_v0  ;;  %1917 = vmatprep.subr.bf16.mxu1 %v2398_v0  ;;  %v367_v33 = vrot.slane %v365_v24, 1  ;;  %v2189_v37 = vld [vmem:[#allocation6 + $0x90] sm:$0xff]   ;;  %v283_v38 = vld [vmem:[%s2618_s10 + $0x20] sm:$0xf]  ;;  %v2192_v44 = vld [vmem:[#allocation6 + $0xa0] sm:$0xff]   ;;  %v369_v45 = vshrl.u32 %v2655_v17, 16 }
  0x71   : > { %v347_v26 = vor.u32 %v346_v20, %v342_v19  ;;  %v355_v36 = vor.u32 %v353_v30, %v351_v27  ;;  %v2191_v40 = vld [vmem:[#allocation6 + $0x98] sm:$0xff]   ;;  %v363_v41 = vor.u32 %v361_v32, %v359_v31  ;;  %v1718_v42 = vcombine.low %v283_v38, %v283_v38  ;;  %v2194_v49 = vld [vmem:[#allocation6 + $0xa8] sm:$0xff]   ;;  %v2195_v51 = vld [vmem:[#allocation6 + $0xb0] sm:$0xff]   ;;  %s1713_s11 = sshll.u32 %s2614_s17, 6  ;;  %s1798_s13 = sshll.u32 %s2454_s22, 10 }
  0x72   : > { %v371_v47 = vor.u32 %v369_v45, %v367_v33  ;;  %v2196_v53 = vld [vmem:[#allocation6 + $0xb8] sm:$0xff]   ;;  %v648_v55 = vrot.slane %v2643_v11, 1  ;;  %v649_v56 = vrot.slane %v2646_v12, 1  ;;  %v651_v58 = vrot.slane %v2649_v14, 1  ;;  %v2197_v1 = vld [vmem:[#allocation8] sm:$0xff]   ;;  %v2198_v2 = vld [vmem:[#allocation8 + $0x8] sm:$0xff]   ;;  %s2976_s15 = scalar_lea.hbm %s3028_s5, %s1798_s13 }
  0x73   : > { %1882 = vmatpush3.bf16.msra.mxu0 %v2172_v5  ;;  %1918 = vmatpush3.bf16.msra.mxu1 %v2173_v6  ;;  %v352_v34 = vsel %vm340_vm1, %v347_v26, %v351_v27  ;;  %v360_v39 = vsel %vm340_vm1, %v355_v36, %v359_v31  ;;  %v368_v43 = vsel %vm340_vm1, %v363_v41, %v367_v33  ;;  %v373_v46 = vshll.u32 %v1718_v42, 16  ;;  %v2200_v3 = vld [vmem:[#allocation8 + $0x10] sm:$0xff]   ;;  %v2202_v4 = vld [vmem:[#allocation8 + $0x18] sm:$0xff]   ;;  %v2199_v5 = vld [vmem:[#allocation8 + $0x40] sm:$0xff]   ;;  %s2938_s12 = scalar_lea.vmem [#allocation9], %s1713_s11  ;;  %s1599_s14 = scalar_lea.sflag [#allocation5], %s2614_s17 }
  0x74   : > { %1883 = vmatprep.subr.bf16.mxu0 %v2398_v0  ;;  %1919 = vmatprep.subr.bf16.mxu1 %v2398_v0  ;;  %v377_v52 = vshrl.u32 %v1718_v42, 16  ;;  %v650_v57 = vsel %vm647_vm2, %v648_v55, %v649_v56  ;;  %v652_v59 = vsel %vm647_vm2, %v649_v56, %v651_v58  ;;  %v653_v60 = vrot.slane %v2655_v17, 1  ;;  %v2204_v6 = vld [vmem:[#allocation8 + $0x20] sm:$0xff]   ;;  %v2214_v16 = vld [vmem:[#allocation8 + $0x78] sm:$0xff]   ;;  %vm2761_vm8 = vmor %vm844_vm5, %vm845_vm6  ;;  %s1612_s30 = sshll.u32 %s2938_s12, 4  ;;  %p3062_p0 = scmp.ne.s32.totalorder %s3038_s23, 0  ;;  %s2978_s30 = int_to_ptr.vmem [resolvable:$true] %s1612_s30 }
  0x75   : > { %v375_v48 = vrot.slane %v373_v46, 1  ;;  %v655_v62 = vrot.slane %v1718_v42, 1  ;;  %vm2773_vm10 = vmand %vm953_vm9, %vm844_vm5  ;;  %vm963_vm12 = vsmask.f32 1280  ;;  %vm968_vm15 = vsmask.f32 7942 }
  0x76   : > { %v654_v61 = vsel %vm647_vm2, %v651_v58, %v653_v60  ;;  %vm2788_vm13 = vmand %vm953_vm9, %vm936_vm4  ;;  %vm973_vm4 = vcmask 1042434   ;;  %vm974_vm5 = vsmask.f32 2304  ;;  %vm948_vm9 = vsmask.f32 3328  ;;  %s2321_s6 = scalar_lea.vmem %s2978_s30, 1024 }
  0x77   : > { %1884 = vmatpush3.bf16.msra.mxu0 %v2174_v7  ;;  %1920 = vmatpush3.bf16.msra.mxu1 %v2175_v8  ;;  %v376_v50 = vsel %vm340_vm1, %v371_v47, %v375_v48  ;;  %v379_v54 = vor.u32 %v377_v52, %v375_v48  ;;  %v656_v63 = vsel %vm647_vm2, %v653_v60, %v655_v62  ;;  %v2201_v7 = vld [vmem:[#allocation8 + $0x48] sm:$0xff]   ;;  %vm2794_vm14 = vmand %vm962_vm11, %vm963_vm12  ;;  %p2322_p11 = scmp.ne.s32.totalorder %s2978_s30, %s2321_s6  ;;  %s2400_s22 = smov [#allocation9]  }
  0x78   : > { %1885 = vmatprep.subr.bf16.mxu0 %v2398_v0  ;;  %1921 = vmatprep.subr.bf16.mxu1 %v2398_v0  ;;  %v2205_v8 = vld [vmem:[#allocation8 + $0x28] sm:$0xff]   ;;  %vm2814_vm6 = vmand %vm962_vm11, %vm968_vm15  ;;  %vm979_vm11 = vsmask.f32 7946  ;;  %s2325_s9 = sshll.u32 %s2400_s22, 4  ;;  %s2326_s9 = int_to_ptr.vmem [resolvable:$false] %s2325_s9 }
  0x79   : > { %vm2840_vm12 = vmand %vm935_vm3, %vm948_vm9  ;;  %p2323_p2 = pnand %p2322_p11, %p3062_p0  ;;  %p2328_p7 = scmp.lt.s32.totalorder %s2978_s30, %s2326_s9 }
  0x7a   : > { %vm2854_vm3 = vmand %vm973_vm4, %vm979_vm11 }
  0x7b   : > { %1886 = vmatpush3.bf16.msra.mxu0 %v2176_v9  ;;  %1922 = vmatpush3.bf16.msra.mxu1 %v2177_v10  ;;  %v2203_v9 = vld [vmem:[#allocation8 + $0x50] sm:$0xff]   ;;  %p2324_p3 = pneg %p2323_p2 }
  0x7c   : > { %1887 = vmatprep.subr.bf16.mxu0 %v2398_v0  ;;  %1923 = vmatprep.subr.bf16.mxu1 %v2398_v0  ;;  %v2207_v10 = vld [vmem:[#allocation8 + $0x30] sm:$0xff]  }
  0x7f   : > { %1888 = vmatpush3.bf16.msra.mxu0 %v2178_v13  ;;  %1924 = vmatpush3.bf16.msra.mxu1 %v2179_v15  ;;  %v2208_v13 = vld [vmem:[#allocation8 + $0x60] sm:$0xff]   ;;  %v2212_v15 = vld [vmem:[#allocation8 + $0x70] sm:$0xff]  }
  0x80   : > { %1889 = vmatprep.subr.bf16.mxu0 %v2398_v0  ;;  %1925 = vmatprep.subr.bf16.mxu1 %v2398_v0 }
  0x83   : > { %1890 = vmatpush3.bf16.msra.mxu0 %v2180_v18  ;;  %1926 = vmatpush3.bf16.msra.mxu1 %v2181_v22 }
  0x84   : > { %1891 = vmatprep.subr.bf16.mxu0 %v2398_v0  ;;  %1927 = vmatprep.subr.bf16.mxu1 %v2398_v0 }
  0x87   : > { %1892 = vmatpush3.bf16.msra.mxu0 %v2182_v25  ;;  %1928 = vmatpush3.bf16.msra.mxu1 %v2183_v28 }
  0x88   : > { %1949 = vmatprep.subr.bf16.mxu0 %v2398_v0  ;;  %1985 = vmatprep.subr.bf16.mxu1 %v2398_v0 }
  0x8a   : > { %1894 = vmatmul.mubr.bf16.vlgmr.msra.gmra.mrb[0].mxu0 %v352_v34  ;;  %1930 = vmatmul.mubr.bf16.vlgmr.msra.gmra.mrb[0].mxu1 %v2643_v11  ;;  %v2206_v11 = vld [vmem:[#allocation8 + $0x58] sm:$0xff]  }
  0x8b   : > { %1950 = vmatpush3.bf16.msra.mxu0 %v2186_v29  ;;  %1897 = vmatprep.mubr.msk.bf16.mxu0 %vm2399_vm0, %v2398_v0 }
  0x8c   : > { %1951 = vmatprep.subr.bf16.mxu0 %v2398_v0  ;;  %1933 = vmatprep.mubr.msk.bf16.mxu1 %vm2399_vm0, %v2398_v0 }
  0x8d   : > { %1986 = vmatpush3.bf16.msra.mxu1 %v2199_v5 }
  0x8e   : > { %1987 = vmatprep.subr.bf16.mxu1 %v2398_v0 }
  0x8f   : > { %1952 = vmatpush3.bf16.msra.mxu0 %v2187_v35 }
  0x90   : > { %1953 = vmatprep.subr.bf16.mxu0 %v2398_v0 }
  0x91   : > { %1988 = vmatpush3.bf16.msra.mxu1 %v2201_v7 }
  0x92   : > { %1898 = vmatmul.mubr.bf16.gmra.mrb[4].mxu0 %v360_v39  ;;  %1934 = vmatmul.mubr.bf16.gmra.mrb[4].mxu1 %v2646_v12  ;;  %v2209_v12 = vld [vmem:[#allocation8 + $0x38] sm:$0xff]  }
  0x93   : > { %1954 = vmatpush3.bf16.msra.mxu0 %v2189_v37  ;;  %1901 = vmatprep.mubr.msk.bf16.mxu0 %vm2399_vm0, %v2398_v0 }
  0x94   : > { %1937 = vmatprep.mubr.msk.bf16.mxu1 %vm2399_vm0, %v2398_v0  ;;  %1955 = vmatprep.subr.bf16.mxu0 %v2398_v0 }
  0x95   : > { %1989 = vmatprep.subr.bf16.mxu1 %v2398_v0 }
  0x96   : > { %1990 = vmatpush3.bf16.msra.mxu1 %v2203_v9 }
  0x97   : > { %1956 = vmatpush3.bf16.msra.mxu0 %v2191_v40  ;;  %1991 = vmatprep.subr.bf16.mxu1 %v2398_v0 }
  0x98   : > { %1957 = vmatprep.subr.bf16.mxu0 %v2398_v0 }
  0x9a   : > { %1902 = vmatmul.mubr.bf16.gmra.mrb[8].mxu0 %v368_v43  ;;  %1938 = vmatmul.mubr.bf16.gmra.mrb[8].mxu1 %v2649_v14  ;;  %v2210_v14 = vld [vmem:[#allocation8 + $0x68] sm:$0xff]  }
  0x9b   : > { %1958 = vmatpush3.bf16.msra.mxu0 %v2192_v44  ;;  %1905 = vmatprep.mubr.msk.bf16.mxu0 %vm2399_vm0, %v2398_v0 }
  0x9c   : > { %1941 = vmatprep.mubr.msk.bf16.mxu1 %vm2399_vm0, %v2398_v0  ;;  %1959 = vmatprep.subr.bf16.mxu0 %v2398_v0 }
  0x9d   : > { %1992 = vmatpush3.bf16.msra.mxu1 %v2206_v11 }
  0x9e   : > { %1993 = vmatprep.subr.bf16.mxu1 %v2398_v0 }
  0x9f   : > { %1960 = vmatpush3.bf16.msra.mxu0 %v2194_v49 }
  0xa0   : > { %1961 = vmatprep.subr.bf16.mxu0 %v2398_v0 }
  0xa1   : > { %1994 = vmatpush3.bf16.msra.mxu1 %v2208_v13 }
  0xa2   : > { %1906 = vmatmul.mubr.bf16.gmra.mrb[12].mxu0 %v376_v50  ;;  %1942 = vmatmul.mubr.bf16.gmra.mrb[12].mxu1 %v2655_v17 }
  0xa3   : > { %1909 = vmatprep.mubr.msk.bf16.mxu0 %vm2399_vm0, %v2398_v0  ;;  %1962 = vmatpush3.bf16.msra.mxu0 %v2195_v51 }
  0xa4   : > { %1945 = vmatprep.mubr.msk.bf16.mxu1 %vm2399_vm0, %v2398_v0  ;;  %1963 = vmatprep.subr.bf16.mxu0 %v2398_v0 }
  0xa5   : > { %1995 = vmatprep.subr.bf16.mxu1 %v2398_v0 }
  0xa6   : > { %1996 = vmatpush3.bf16.msra.mxu1 %v2210_v14 }
  0xa7   : > { %1964 = vmatpush3.bf16.msra.mxu0 %v2196_v53  ;;  %1997 = vmatprep.subr.bf16.mxu1 %v2398_v0 }
  0xa8   : > { %2021 = vmatprep.subr.bf16.mxu0 %v2398_v0 }
  0xaa   : > { %1910 = vmatmul.mubr.bf16.gmra.mrb[16].mxu0 %v379_v54  ;;  %1946 = vmatmul.mubr.bf16.gmra.mrb[16].mxu1 %v1718_v42 }
  0xab   : > { %1965 = vmatprep.mubr.msk.bf16.mxu0 %vm2399_vm0, %v2398_v0  ;;  %2001 = vmatprep.mubr.msk.bf16.mxu1 %vm2399_vm0, %v2398_v0 }
  0xac   : > { %1998 = vmatpush3.bf16.msra.mxu1 %v2212_v15 }
  0xad   : > { %1999 = vmatprep.subr.bf16.mxu1 %v2398_v0 }
  0xb0   : > { %2000 = vmatpush3.bf16.msra.mxu1 %v2214_v16 }
  0xb1   : > { %2057 = vmatprep.subr.bf16.mxu1 %v2398_v0 }
  0xb2   : > { %1966 = vmatmul.mubr.bf16.vlgmr.msra.gmra.mrb[20].mxu0 %v650_v57 }
  0xb3   : > { %1969 = vmatprep.mubr.msk.bf16.mxu0 %vm2399_vm0, %v2398_v0  ;;  %2022 = vmatpush3.bf16.msra.mxu0 %v2197_v1 }
  0xb4   : > { %2023 = vmatprep.subr.bf16.mxu0 %v2398_v0 }
  0xb7   : > { %2024 = vmatpush3.bf16.msra.mxu0 %v2198_v2 }
  0xb8   : > { %2025 = vmatprep.subr.bf16.mxu0 %v2398_v0 }
  0xba   : > { %1970 = vmatmul.mubr.bf16.gmra.mrb[24].mxu0 %v652_v59 }
  0xbb   : > { %1973 = vmatprep.mubr.msk.bf16.mxu0 %vm2399_vm0, %v2398_v0  ;;  %2026 = vmatpush3.bf16.msra.mxu0 %v2200_v3 }
  0xbc   : > { %2027 = vmatprep.subr.bf16.mxu0 %v2398_v0 }
  0xbf   : > { %2028 = vmatpush3.bf16.msra.mxu0 %v2202_v4  ;;  %v2753_v4 = vld [vmem:[%s3026_s3] ss:$0 sm:$0xff] }
  0xc0   : > { %2029 = vmatprep.subr.bf16.mxu0 %v2398_v0 }
  0xc2   : > { %1974 = vmatmul.mubr.bf16.gmra.mrb[28].mxu0 %v654_v61 }
  0xc3   : > { %1977 = vmatprep.mubr.msk.bf16.mxu0 %vm2399_vm0, %v2398_v0  ;;  %2030 = vmatpush3.bf16.msra.mxu0 %v2204_v6 }
  0xc4   : > { %2031 = vmatprep.subr.bf16.mxu0 %v2398_v0 }
  0xc7   : > { %2032 = vmatpush3.bf16.msra.mxu0 %v2205_v8 }
  0xc8   : > { %2033 = vmatprep.subr.bf16.mxu0 %v2398_v0 }
  0xca   : > { %1978 = vmatmul.mubr.bf16.gmra.mrb[32].mxu0 %v656_v63 }
  0xcb   : > { %1981 = vmatprep.mubr.msk.bf16.mxu0 %vm2399_vm0, %v2398_v0  ;;  %2034 = vmatpush3.bf16.msra.mxu0 %v2207_v10 }
  0xcc   : > { %2035 = vmatprep.subr.bf16.mxu0 %v2398_v0 }
  0xcf   : > { %2036 = vmatpush3.bf16.msra.mxu0 %v2209_v12 }
  0xd2   : > { %1982 = vmatmul.mubr.bf16.gmra.mrb[36].mxu0 %v655_v62 }
  0xd3   : > { %2037 = vmatprep.mubr.msk.bf16.mxu0 %vm2399_vm0, %v2398_v0 }
 0x15d   : > { %v467_v17 = vpop.f32.mrb[0].mxu0  ;;  %v592_v18 = vpop.f32.mrb[0].mxu1 }
 0x15e   : > { %v1895_v19 = vpop.f32.mrb[1].mxu0  ;;  %v593_v20 = vadd.f32 %v592_v18, %v467_v17  ;;  %v1931_v21 = vpop.f32.mrb[1].mxu1 }
 0x15f   : > { %v470_v22 = vpop.f32.mrb[2].mxu0  ;;  %v595_v23 = vpop.f32.mrb[2].mxu1 }
 0x160   : > { %v1896_v24 = vpop.f32.mrb[3].mxu0  ;;  %v596_v25 = vadd.f32 %v595_v23, %v470_v22  ;;  %v1932_v26 = vpop.f32.mrb[3].mxu1 }
 0x161   : > { %v938_v26 = vld [vmem:[#allocation2] sm:$0xf] }
 0x165   : > { %v475_v27 = vpop.f32.mrb[4].mxu0  ;;  %v600_v28 = vpop.f32.mrb[4].mxu1 }
 0x166   : > { %v1899_v29 = vpop.f32.mrb[5].mxu0  ;;  %v601_v30 = vadd.f32 %v600_v28, %v475_v27  ;;  %v1935_v31 = vpop.f32.mrb[5].mxu1 }
 0x167   : > { %v478_v32 = vpop.f32.mrb[6].mxu0  ;;  %v603_v33 = vpop.f32.mrb[6].mxu1 }
 0x168   : > { %v1900_v34 = vpop.f32.mrb[7].mxu0  ;;  %v604_v35 = vadd.f32 %v603_v33, %v478_v32  ;;  %v1936_v36 = vpop.f32.mrb[7].mxu1 }
 0x16d   : > { %v483_v37 = vpop.f32.mrb[8].mxu0  ;;  %v608_v38 = vpop.f32.mrb[8].mxu1 }
 0x16e   : > { %v1903_v39 = vpop.f32.mrb[9].mxu0  ;;  %v2740_v40 = vadd.f32 %v608_v38, %v483_v37  ;;  %v1939_v41 = vpop.f32.mrb[9].mxu1 }
 0x16f   : > { %v486_v42 = vpop.f32.mrb[10].mxu0  ;;  %v611_v43 = vpop.f32.mrb[10].mxu1 }
 0x170   : > { %v1904_v44 = vpop.f32.mrb[11].mxu0  ;;  %v2742_v45 = vadd.f32 %v611_v43, %v486_v42  ;;  %v1940_v46 = vpop.f32.mrb[11].mxu1 }
 0x175   : > { %v491_v47 = vpop.f32.mrb[12].mxu0  ;;  %v616_v48 = vpop.f32.mrb[12].mxu1 }
 0x176   : > { %v1907_v49 = vpop.f32.mrb[13].mxu0  ;;  %v2744_v50 = vadd.f32 %v616_v48, %v491_v47  ;;  %v1943_v51 = vpop.f32.mrb[13].mxu1 }
 0x177   : > { %v494_v52 = vpop.f32.mrb[14].mxu0  ;;  %v619_v53 = vpop.f32.mrb[14].mxu1 }
 0x178   : > { %v1908_v54 = vpop.f32.mrb[15].mxu0  ;;  %v2746_v55 = vadd.f32 %v619_v53, %v494_v52  ;;  %v1944_v56 = vpop.f32.mrb[15].mxu1 }
 0x17d   : > { %v499_v57 = vpop.f32.mrb[16].mxu0  ;;  %v624_v59 = vpop.f32.mrb[16].mxu1 }
 0x17e   : > { %v1911_v58 = vpop.f32.mrb[17].mxu0  ;;  %v2748_v60 = vadd.f32 %v624_v59, %v499_v57  ;;  %v1947_v62 = vpop.f32.mrb[17].mxu1 }
 0x17f   : > { %v502_v61 = vpop.f32.mrb[18].mxu0  ;;  %v627_v1 = vpop.f32.mrb[18].mxu1 }
 0x180   : > { %v1912_v63 = vpop.f32.mrb[19].mxu0  ;;  %v1948_v2 = vpop.f32.mrb[19].mxu1 }
 0x185   : > { %v744_v3 = vpop.f32.mrb[20].mxu0 }
 0x186   : > { %v782_v5 = vadd.f32 %v744_v3, %v593_v20  ;;  %v1967_v6 = vpop.f32.mrb[21].mxu0 }
 0x187   : > { %v747_v7 = vpop.f32.mrb[22].mxu0 }
 0x188   : > { %v798_v8 = vadd.f32 %v2753_v4, %v782_v5  ;;  %v783_v9 = vadd.f32 %v747_v7, %v596_v25  ;;  %v1968_v10 = vpop.f32.mrb[23].mxu0 }
 0x18a   : > { %v807_v11 = vmax.f32 %v798_v8, 0.0  ;;  %v799_v12 = vadd.f32 %v2753_v4, %v783_v9 }
 0x18c   : > { %v1789_v13 = vpack.c.bf16 %v807_v11, %v807_v11  ;;  %v808_v14 = vmax.f32 %v799_v12, 0.0 }
 0x18d   : > { %v752_v15 = vpop.f32.mrb[24].mxu0 }
 0x18e   : > { %v848_v16 = vshrl.u32 %v1789_v13, 16  ;;  %v1790_v17 = vpack.c.bf16 %v808_v14, %v808_v14  ;;  %v784_v18 = vadd.f32 %v752_v15, %v601_v30  ;;  %v1971_v19 = vpop.f32.mrb[25].mxu0  ;;  %v851_v22 = vshll.u32 %v1789_v13, 16 }
 0x18f   : > { %v755_v20 = vpop.f32.mrb[26].mxu0 }
 0x190   : > { %v850_v21 = vrot.slane %v848_v16, 7  ;;  %v856_v23 = vshrl.u32 %v1790_v17, 16  ;;  %v800_v24 = vadd.f32 %v2753_v4, %v784_v18  ;;  %v1972_v25 = vpop.f32.mrb[27].mxu0  ;;  %v785_v27 = vadd.f32 %v755_v20, %v604_v35 }
 0x191   : > { %v859_v31 = vshll.u32 %v1790_v17, 16 }
 0x192   : > { %v853_v28 = vor.u32 %v851_v22, %v850_v21  ;;  %v858_v29 = vrot.slane %v856_v23, 7  ;;  %v809_v32 = vmax.f32 %v800_v24, 0.0  ;;  %v801_v33 = vadd.f32 %v2753_v4, %v785_v27 }
 0x193   : > { %v854_v34 = vrot.slane %v850_v21, 4 }
 0x194   : > { %v939_v36 = vsel %vm937_vm7, %v853_v28, %v938_v26  ;;  %v861_v37 = vor.u32 %v859_v31, %v858_v29  ;;  %v1791_v38 = vpack.c.bf16 %v809_v32, %v809_v32  ;;  %v810_v39 = vmax.f32 %v801_v33, 0.0  ;;  %vm2822_vm7 = vmand %vm973_vm4, %vm974_vm5 }
 0x195   : > { %940 = vst [vmem:[#allocation2] sm:$0xf] %v939_v36  ;;  %v760_v41 = vpop.f32.mrb[28].mxu0 }
 0x196   : > { %v862_v35 = vsel %vm2761_vm8, %v854_v34, %v861_v37  ;;  %v865_v42 = vshrl.u32 %v1791_v38, 16  ;;  %v786_v43 = vadd.f32 %v760_v41, %v2740_v40  ;;  %v1975_v44 = vpop.f32.mrb[29].mxu0  ;;  %v1792_v46 = vpack.c.bf16 %v810_v39, %v810_v39 }
 0x197   : > { %941 = vst [vmem:[#allocation2 + $0x4] sm:$0xf] %v862_v35  ;;  %v763_v47 = vpop.f32.mrb[30].mxu0  ;;  %v868_v49 = vshll.u32 %v1791_v38, 16  ;;  %v863_v40 = vrot.slane %v858_v29, 4 }
 0x198   : > { %v867_v48 = vrot.slane %v865_v42, 7  ;;  %v802_v51 = vadd.f32 %v2753_v4, %v786_v43  ;;  %v787_v52 = vadd.f32 %v763_v47, %v2742_v45  ;;  %v1976_v53 = vpop.f32.mrb[31].mxu0  ;;  %v874_v54 = vshrl.u32 %v1792_v46, 16 }
 0x199   : > { %v877_v62 = vshll.u32 %v1792_v46, 16  ;;  %v2224_v53 = vld [vmem:[#allocation8 + $0xb0] sm:$0xff]  }
 0x19a   : > { %v870_v57 = vor.u32 %v868_v49, %v867_v48  ;;  %v811_v58 = vmax.f32 %v802_v51, 0.0  ;;  %v803_v59 = vadd.f32 %v2753_v4, %v787_v52  ;;  %v876_v61 = vrot.slane %v874_v54, 7 }
 0x19b   : > { %v872_v5 = vrot.slane %v867_v48, 4 }
 0x19c   : > { %v955_v63 = vld [vmem:[#allocation2] sm:$0x1]  ;;  %v871_v1 = vsel %vm2761_vm8, %v863_v40, %v870_v57  ;;  %v1793_v45 = vpack.c.bf16 %v811_v58, %v811_v58  ;;  %v812_v2 = vmax.f32 %v803_v59, 0.0  ;;  %v879_v6 = vor.u32 %v877_v62, %v876_v61 }
 0x19d   : > { %v956_v3 = vsel %vm2773_vm10, 0, %v955_v63  ;;  %942 = vst [vmem:[#allocation2 + $0x8] sm:$0xf] %v871_v1  ;;  %v768_v7 = vpop.f32.mrb[32].mxu0  ;;  %vm984_vm10 = vcmask 1043459  }
 0x19e   : > { %957 = vst [vmem:[#allocation2] sm:$0x1] %v956_v3  ;;  %v883_v8 = vshrl.u32 %v1793_v45, 16  ;;  %v1794_v9 = vpack.c.bf16 %v812_v2, %v812_v2  ;;  %v788_v10 = vadd.f32 %v768_v7, %v2744_v50  ;;  %v1979_v11 = vpop.f32.mrb[33].mxu0  ;;  %v880_v12 = vsel %vm2761_vm8, %v872_v5, %v879_v6 }
 0x19f   : > { %v771_v13 = vpop.f32.mrb[34].mxu0  ;;  %943 = vst [vmem:[#allocation2 + $0xc] sm:$0xf] %v880_v12  ;;  %v886_v15 = vshll.u32 %v1793_v45, 16  ;;  %v881_v50 = vrot.slane %v876_v61, 4 }
 0x1a0   : > { %v885_v14 = vrot.slane %v883_v8, 7  ;;  %v892_v16 = vshrl.u32 %v1794_v9, 16  ;;  %v804_v17 = vadd.f32 %v2753_v4, %v788_v10  ;;  %v1980_v18 = vpop.f32.mrb[35].mxu0  ;;  %v789_v20 = vadd.f32 %v771_v13, %v2746_v55 }
 0x1a1   : > { %v895_v24 = vshll.u32 %v1794_v9, 16 }
 0x1a2   : > { %v888_v22 = vor.u32 %v886_v15, %v885_v14  ;;  %v894_v23 = vrot.slane %v892_v16, 7  ;;  %v813_v25 = vmax.f32 %v804_v17, 0.0  ;;  %v805_v26 = vadd.f32 %v2753_v4, %v789_v20  ;;  %v2215_v16 = vld [vmem:[#allocation8 + $0x80] sm:$0xff]  }
 0x1a3   : > { %v890_v31 = vrot.slane %v885_v14, 4 }
 0x1a4   : > { %v959_v27 = vld [vmem:[#allocation2 + $0x8] sm:$0x1]  ;;  %v965_v28 = vld [vmem:[#allocation2 + $0x8] sm:$0x2]  ;;  %v889_v29 = vsel %vm2761_vm8, %v881_v50, %v888_v22  ;;  %v897_v32 = vor.u32 %v895_v24, %v894_v23  ;;  %v1795_v33 = vpack.c.bf16 %v813_v25, %v813_v25  ;;  %v814_v36 = vmax.f32 %v805_v26, 0.0 }
 0x1a5   : > { %v960_v55 = vsel %vm2788_vm13, 0, %v959_v27  ;;  %v966_v34 = vsel %vm2794_vm14, 0, %v965_v28  ;;  %944 = vst [vmem:[#allocation2 + $0x10] sm:$0xf] %v889_v29  ;;  %v776_v37 = vpop.f32.mrb[36].mxu0  ;;  %v2808_v42 = vld [vmem:[#allocation2] sm:$0xff]   ;;  %vm2847_vm13 = vmand %vm984_vm10, %vm948_vm9 }
 0x1a6   : > { %961 = vst [vmem:[#allocation2 + $0x8] sm:$0x1] %v960_v55  ;;  %967 = vst [vmem:[#allocation2 + $0x8] sm:$0x2] %v966_v34  ;;  %v898_v38 = vsel %vm2761_vm8, %v890_v31, %v897_v32  ;;  %v901_v39 = vshrl.u32 %v1795_v33, 16  ;;  %v790_v41 = vadd.f32 %v776_v37, %v2748_v60  ;;  %v1983_v35 = vpop.f32.mrb[37].mxu0  ;;  %v1796_v43 = vpack.c.bf16 %v814_v36, %v814_v36 }
 0x1a7   : > { %945 = vst [vmem:[#allocation2 + $0x14] sm:$0xf] %v898_v38  ;;  %v779_v44 = vpop.f32.mrb[38].mxu0  ;;  %v904_v47 = vshll.u32 %v1795_v33, 16  ;;  %2038 = vmatmul.mubr.bf16.vlgmr.msra.gmra.mrb[40].mxu0 %v2808_v42  ;;  %v1062_v52 = vshll.u32 %v2808_v42, 16  ;;  %v1060_v8 = vshrl.u32 %v2808_v42, 16 }
 0x1a8   : > { %v903_v46 = vrot.slane %v901_v39, 7  ;;  %v806_v48 = vadd.f32 %v2753_v4, %v790_v41  ;;  %v1984_v49 = vpop.f32.mrb[39].mxu0  ;;  %v910_v60 = vshrl.u32 %v1796_v43, 16  ;;  %2041 = vmatprep.mubr.msk.bf16.mxu0 %vm2399_vm0, %v2398_v0  ;;  %v899_v4 = vrot.slane %v894_v23, 4  ;;  %v950_v50 = vld [vmem:[#allocation2 + $0x20] sm:$0xf] }
 0x1a9   : > { %v913_v57 = vshll.u32 %v1796_v43, 16  ;;  %v1064_v5 = vrot.slane %v1062_v52, 1  ;;  %v2217_v28 = vld [vmem:[#allocation8 + $0x88] sm:$0xff]   ;;  %v2219_v33 = vld [vmem:[#allocation8 + $0x90] sm:$0xff]   ;;  %v2220_v34 = vld [vmem:[#allocation8 + $0x98] sm:$0xff]  }
 0x1aa   : > { %v906_v54 = vor.u32 %v904_v47, %v903_v46  ;;  %v815_v56 = vmax.f32 %v806_v48, 0.0  ;;  %v912_v40 = vrot.slane %v910_v60, 7  ;;  %v908_v62 = vrot.slane %v903_v46, 4  ;;  %v2222_v44 = vld [vmem:[#allocation8 + $0xa0] sm:$0xff]   ;;  %v2223_v47 = vld [vmem:[#allocation8 + $0xa8] sm:$0xff]  }
 0x1ab   : > { %v1065_v14 = vor.u32 %v1064_v5, %v1060_v8 }
 0x1ac   : > { %v970_v58 = vld [vmem:[#allocation2 + $0x10] sm:$0x2]  ;;  %v976_v59 = vld [vmem:[#allocation2 + $0x10] sm:$0x4]  ;;  %v907_v61 = vsel %vm2761_vm8, %v899_v4, %v906_v54  ;;  %v1797_v63 = vpack.c.bf16 %v815_v56, %v815_v56  ;;  %v915_v2 = vor.u32 %v913_v57, %v912_v40  ;;  %v917_v18 = vrot.slane %v912_v40, 4  ;;  %v2225_v54 = vld [vmem:[#allocation8 + $0xb8] sm:$0xff]  }
 0x1ad   : > { %v971_v1 = vsel %vm2814_vm6, 0, %v970_v58  ;;  %v977_v45 = vsel %vm2822_vm7, 0, %v976_v59  ;;  %946 = vst [vmem:[#allocation2 + $0x18] sm:$0xf] %v907_v61  ;;  %v2832_v3 = vld [vmem:[#allocation2 + $0x8] sm:$0xff]   ;;  %v1365_v58 = vrot.slane %v2808_v42, 1 }
 0x1ae   : > { %972 = vst [vmem:[#allocation2 + $0x10] sm:$0x2] %v971_v1  ;;  %978 = vst [vmem:[#allocation2 + $0x10] sm:$0x4] %v977_v45  ;;  %v919_v6 = vshrl.u32 %v1797_v63, 16  ;;  %v916_v7 = vsel %vm2761_vm8, %v908_v62, %v915_v2  ;;  %v1067_v9 = vshll.u32 %v2832_v3, 16 }
 0x1af   : > { %947 = vst [vmem:[#allocation2 + $0x1c] sm:$0xf] %v916_v7  ;;  %v922_v12 = vshll.u32 %v1797_v63, 16  ;;  %2042 = vmatmul.mubr.bf16.gmra.mrb[44].mxu0 %v2832_v3  ;;  %v1071_v30 = vshrl.u32 %v2832_v3, 16  ;;  %v1366_v57 = vrot.slane %v2832_v3, 1 }
 0x1b0   : > { %v921_v11 = vrot.slane %v919_v6, 7  ;;  %v1069_v15 = vrot.slane %v1067_v9, 1  ;;  %2045 = vmatprep.mubr.msk.bf16.mxu0 %vm2399_vm0, %v2398_v0 }
 0x1b1   : > { %v1367_v59 = vsel %vm647_vm2, %v1365_v58, %v1366_v57 }
 0x1b2   : > { %v924_v19 = vor.u32 %v922_v12, %v921_v11  ;;  %v1070_v20 = vsel %vm340_vm1, %v1065_v14, %v1069_v15  ;;  %v1073_v31 = vor.u32 %v1071_v30, %v1069_v15 }
 0x1b3   : > { %2002 = vmatmul.mubr.bf16.vlgmr.msra.gmra.mrb[20].mxu1 %v1070_v20 }
 0x1b4   : > { %v981_v21 = vld [vmem:[#allocation2 + $0x18] sm:$0x4]  ;;  %v986_v22 = vld [vmem:[#allocation2 + $0x18] sm:$0x8]  ;;  %v925_v23 = vsel %vm2761_vm8, %v917_v18, %v924_v19  ;;  %2058 = vmatpush3.bf16.msra.mxu1 %v2215_v16  ;;  %2005 = vmatprep.mubr.msk.bf16.mxu1 %vm2399_vm0, %v2398_v0  ;;  %vm989_vm8 = vsmask.f32 7950 }
 0x1b5   : > { %v982_v24 = vsel %vm2854_vm3, 0, %v981_v21  ;;  %v987_v25 = vsel %vm2847_vm13, 0, %v986_v22  ;;  %v951_v26 = vsel %vm2840_vm12, %v925_v23, %v950_v50  ;;  %v2867_v27 = vld [vmem:[#allocation2 + $0x10] sm:$0xff]   ;;  %2059 = vmatprep.subr.bf16.mxu1 %v2398_v0  ;;  %vm990_vm14 = vmand %vm984_vm10, %vm989_vm8 }
 0x1b6   : > { %983 = vst [vmem:[#allocation2 + $0x18] sm:$0x4] %v982_v24  ;;  %988 = vst [vmem:[#allocation2 + $0x18] sm:$0x8] %v987_v25  ;;  %v1075_v29 = vshll.u32 %v2867_v27, 16  ;;  %v1079_v39 = vshrl.u32 %v2867_v27, 16 }
 0x1b7   : > { %952 = vst [vmem:[#allocation2 + $0x20] sm:$0xf] %v951_v26  ;;  %2046 = vmatmul.mubr.bf16.gmra.mrb[48].mxu0 %v2867_v27  ;;  %v1368_v61 = vrot.slane %v2867_v27, 1 }
 0x1b8   : > { %2060 = vmatpush3.bf16.msra.mxu1 %v2217_v28  ;;  %v1077_v32 = vrot.slane %v1075_v29, 1  ;;  %2049 = vmatprep.mubr.msk.bf16.mxu0 %vm2399_vm0, %v2398_v0 }
 0x1b9   : > { %2061 = vmatprep.subr.bf16.mxu1 %v2398_v0  ;;  %v1369_v62 = vsel %vm647_vm2, %v1366_v57, %v1368_v61 }
 0x1ba   : > { %v1078_v55 = vsel %vm340_vm1, %v1073_v31, %v1077_v32  ;;  %v1081_v35 = vor.u32 %v1079_v39, %v1077_v32 }
 0x1bb   : > { %2006 = vmatmul.mubr.bf16.gmra.mrb[24].mxu1 %v1078_v55 }
 0x1bc   : > { %2062 = vmatpush3.bf16.msra.mxu1 %v2219_v33  ;;  %2009 = vmatprep.mubr.msk.bf16.mxu1 %vm2399_vm0, %v2398_v0 }
 0x1bd   : > { %v2218_v37 = vld [vmem:[#allocation2 + $0x18] sm:$0xff]   ;;  %2063 = vmatprep.subr.bf16.mxu1 %v2398_v0 }
 0x1be   : > { %v991_v36 = vld [vmem:[#allocation2 + $0x20] sm:$0x8]  ;;  %v1083_v41 = vshll.u32 %v2218_v37, 16  ;;  %v2221_v48 = vld [vmem:[#allocation2 + $0x20] ss:$0 sps:$4 sm:$0xff]   ;;  %v1087_v49 = vshrl.u32 %v2218_v37, 16 }
 0x1bf   : > { %v992_v38 = vsel %vm990_vm14, 0, %v991_v36  ;;  %2050 = vmatmul.mubr.bf16.gmra.mrb[52].mxu0 %v2218_v37  ;;  %v1091_v51 = vshll.u32 %v2221_v48, 16  ;;  %v1095_v56 = vshrl.u32 %v2221_v48, 16  ;;  %v1370_v63 = vrot.slane %v2218_v37, 1 }
 0x1c0   : > { %993 = vst [vmem:[#allocation2 + $0x20] sm:$0x8] %v992_v38  ;;  %v1085_v43 = vrot.slane %v1083_v41, 1  ;;  %2064 = vmatpush3.bf16.msra.mxu1 %v2220_v34  ;;  %2053 = vmatprep.mubr.msk.bf16.mxu0 %vm2399_vm0, %v2398_v0  ;;  %v1372_v42 = vrot.slane %v2221_v48, 1 }
 0x1c1   : > { %2065 = vmatprep.subr.bf16.mxu1 %v2398_v0  ;;  %v1093_v52 = vrot.slane %v1091_v51, 1  ;;  %v1371_v1 = vsel %vm647_vm2, %v1368_v61, %v1370_v63 }
 0x1c2   : > { %v1086_v46 = vsel %vm340_vm1, %v1081_v35, %v1085_v43  ;;  %v1089_v60 = vor.u32 %v1087_v49, %v1085_v43  ;;  %v1373_v45 = vsel %vm647_vm2, %v1370_v63, %v1372_v42 }
 0x1c3   : > { %2010 = vmatmul.mubr.bf16.gmra.mrb[28].mxu1 %v1086_v46  ;;  %v1097_v40 = vor.u32 %v1095_v56, %v1093_v52 }
 0x1c4   : > { %2066 = vmatpush3.bf16.msra.mxu1 %v2222_v44  ;;  %2013 = vmatprep.mubr.msk.bf16.mxu1 %vm2399_vm0, %v2398_v0  ;;  %v1094_v4 = vsel %vm340_vm1, %v1089_v60, %v1093_v52  ;;  %v2230_v60 = vld [vmem:[%s2618_s10] sm:$0xff]  }
 0x1c5   : > { %2067 = vmatprep.subr.bf16.mxu1 %v2398_v0  ;;  %v1524_v52 = vunpack.c.l.bf16 %v2230_v60 }
 0x1c7   : > { %2054 = vmatmul.mubr.bf16.gmra.mrb[56].mxu0 %v2221_v48 }
 0x1c8   : > { %2068 = vmatpush3.bf16.msra.mxu1 %v2223_v47 }
 0x1c9   : > { %2069 = vmatprep.subr.bf16.mxu1 %v2398_v0 }
 0x1cb   : > { %2014 = vmatmul.mubr.bf16.gmra.mrb[32].mxu1 %v1094_v4 }
 0x1cc   : > { %2017 = vmatprep.mubr.msk.bf16.mxu1 %vm2399_vm0, %v2398_v0  ;;  %2070 = vmatpush3.bf16.msra.mxu1 %v2224_v53  ;;  %v1525_v53 = vunpack.c.h.bf16 %v2230_v60 }
 0x1cd   : > { %2071 = vmatprep.subr.bf16.mxu1 %v2398_v0 }
 0x1ce   : > { %v1544_v57 = vrot.slane %v1525_v53, 1 }
 0x1d0   : > { %2072 = vmatpush3.bf16.msra.mxu1 %v2225_v54  ;;  %v2231_v54 = vld [vmem:[%s2618_s10 + $0x8] sm:$0xff]  }
 0x1d1   : > { %v1526_v56 = vunpack.c.l.bf16 %v2231_v54 }
 0x1d3   : > { %2018 = vmatmul.mubr.bf16.gmra.mrb[36].mxu1 %v1097_v40  ;;  %v1543_v40 = vrot.slane %v1524_v52, 1  ;;  %v1546_v61 = vrot.slane %v1526_v56, 1 }
 0x1d4   : > { %2073 = vmatprep.mubr.msk.bf16.mxu1 %vm2399_vm0, %v2398_v0 }
 0x1db   : > { %2074 = vmatmul.mubr.bf16.vlgmr.msra.gmra.mrb[40].mxu1 %v1367_v59  ;;  %v2930_v59 = vld [vmem:[%s3027_s4] ss:$0 sm:$0xff] }
 0x1dc   : > { %2077 = vmatprep.mubr.msk.bf16.mxu1 %vm2399_vm0, %v2398_v0 }
 0x1e3   : > { %2078 = vmatmul.mubr.bf16.gmra.mrb[44].mxu1 %v1369_v62 }
 0x1e4   : > { %2081 = vmatprep.mubr.msk.bf16.mxu1 %vm2399_vm0, %v2398_v0 }
 0x1eb   : > { %2082 = vmatmul.mubr.bf16.gmra.mrb[48].mxu1 %v1371_v1  ;;  %v1545_v1 = vsel %vm647_vm2, %v1543_v40, %v1544_v57 }
 0x1ec   : > { %2085 = vmatprep.mubr.msk.bf16.mxu1 %vm2399_vm0, %v2398_v0 }
 0x1f3   : > { %2086 = vmatmul.mubr.bf16.gmra.mrb[52].mxu1 %v1373_v45  ;;  %v1527_v45 = vunpack.c.h.bf16 %v2231_v54 }
 0x1f4   : > { %2089 = vmatprep.mubr.msk.bf16.mxu1 %vm2399_vm0, %v2398_v0 }
 0x1fb   : > { %2090 = vmatmul.mubr.bf16.gmra.mrb[56].mxu1 %v1372_v42 }
 0x27a   : > { %v1310_v2 = vpop.f32.mrb[40].mxu0 }
 0x27b   : > { %v2039_v3 = vpop.f32.mrb[41].mxu0 }
 0x27c   : > { %v1313_v5 = vpop.f32.mrb[42].mxu0 }
 0x27d   : > { %v2040_v6 = vpop.f32.mrb[43].mxu0 }
 0x27e   : > { %v1547_v6 = vsel %vm647_vm2, %v1544_v57, %v1546_v61 }
 0x282   : > { %v1318_v7 = vpop.f32.mrb[44].mxu0 }
 0x283   : > { %v2043_v8 = vpop.f32.mrb[45].mxu0 }
 0x284   : > { %v1321_v9 = vpop.f32.mrb[46].mxu0 }
 0x285   : > { %v2044_v10 = vpop.f32.mrb[47].mxu0 }
 0x286   : > { %v1185_v11 = vpop.f32.mrb[20].mxu1 }
 0x287   : > { %v1311_v12 = vadd.f32 %v1310_v2, %v1185_v11  ;;  %v2003_v13 = vpop.f32.mrb[21].mxu1  ;;  %v1548_v11 = vrot.slane %v1527_v45, 1 }
 0x288   : > { %v1188_v14 = vpop.f32.mrb[22].mxu1 }
 0x289   : > { %v1314_v15 = vadd.f32 %v1313_v5, %v1188_v14  ;;  %v2004_v16 = vpop.f32.mrb[23].mxu1 }
 0x28a   : > { %v1326_v17 = vpop.f32.mrb[48].mxu0 }
 0x28b   : > { %v2047_v18 = vpop.f32.mrb[49].mxu0 }
 0x28c   : > { %v1329_v19 = vpop.f32.mrb[50].mxu0 }
 0x28d   : > { %v2048_v50 = vpop.f32.mrb[51].mxu0 }
 0x28e   : > { %v1193_v0 = vpop.f32.mrb[24].mxu1 }
 0x28f   : > { %v1319_v20 = vadd.f32 %v1318_v7, %v1193_v0  ;;  %v2007_v21 = vpop.f32.mrb[25].mxu1  ;;  %v2232_v7 = vld [vmem:[%s2618_s10 + $0x10] sm:$0xff]  }
 0x290   : > { %v1196_v22 = vpop.f32.mrb[26].mxu1  ;;  %v1528_v8 = vunpack.c.l.bf16 %v2232_v7  ;;  %v1529_v0 = vunpack.c.h.bf16 %v2232_v7 }
 0x291   : > { %v2913_v23 = vadd.f32 %v1321_v9, %v1196_v22  ;;  %v2008_v24 = vpop.f32.mrb[27].mxu1 }
 0x292   : > { %v1334_v25 = vpop.f32.mrb[52].mxu0  ;;  %v1550_v16 = vrot.slane %v1528_v8, 1 }
 0x293   : > { %v2051_v26 = vpop.f32.mrb[53].mxu0 }
 0x294   : > { %v1337_v27 = vpop.f32.mrb[54].mxu0  ;;  %v2233_v26 = vld [vmem:[%s2618_s10 + $0x18] sm:$0xff]  }
 0x295   : > { %v2052_v28 = vpop.f32.mrb[55].mxu0 }
 0x296   : > { %v1201_v30 = vpop.f32.mrb[28].mxu1 }
 0x297   : > { %v2915_v29 = vadd.f32 %v1326_v17, %v1201_v30  ;;  %v2011_v31 = vpop.f32.mrb[29].mxu1  ;;  %v1552_v30 = vrot.slane %v1529_v0, 1 }
 0x298   : > { %v1204_v32 = vpop.f32.mrb[30].mxu1 }
 0x299   : > { %v2917_v33 = vadd.f32 %v1329_v19, %v1204_v32  ;;  %v2012_v55 = vpop.f32.mrb[31].mxu1  ;;  %v1549_v19 = vsel %vm647_vm2, %v1546_v61, %v1548_v11 }
 0x29a   : > { %v1342_v34 = vpop.f32.mrb[56].mxu0 }
 0x29b   : > { %v2055_v36 = vpop.f32.mrb[57].mxu0 }
 0x29c   : > { %v1345_v37 = vpop.f32.mrb[58].mxu0 }
 0x29d   : > { %v2056_v38 = vpop.f32.mrb[59].mxu0 }
 0x29e   : > { %v1209_v39 = vpop.f32.mrb[32].mxu1  ;;  %v1553_v38 = vsel %vm647_vm2, %v1550_v16, %v1552_v30 }
 0x29f   : > { %v2919_v41 = vadd.f32 %v1334_v25, %v1209_v39  ;;  %v2015_v35 = vpop.f32.mrb[33].mxu1  ;;  %v1551_v25 = vsel %vm647_vm2, %v1548_v11, %v1550_v16 }
 0x2a0   : > { %v1212_v43 = vpop.f32.mrb[34].mxu1  ;;  %v1531_v35 = vunpack.c.h.bf16 %v2233_v26 }
 0x2a1   : > { %v2921_v44 = vadd.f32 %v1337_v27, %v1212_v43  ;;  %v2016_v46 = vpop.f32.mrb[35].mxu1  ;;  %v1530_v27 = vunpack.c.l.bf16 %v2233_v26 }
 0x2a2   : > { %v1556_v53 = vrot.slane %v1531_v35, 1 }
 0x2a6   : > { %v1217_v47 = vpop.f32.mrb[36].mxu1 }
 0x2a7   : > { %v2923_v48 = vadd.f32 %v1342_v34, %v1217_v47  ;;  %v2019_v49 = vpop.f32.mrb[37].mxu1  ;;  %v1554_v34 = vrot.slane %v1530_v27, 1 }
 0x2a8   : > { %v1220_v51 = vpop.f32.mrb[38].mxu1 }
 0x2a9   : > { %v2020_v4 = vpop.f32.mrb[39].mxu1  ;;  %v1555_v49 = vsel %vm647_vm2, %v1552_v30, %v1554_v34  ;;  %v2234_v51 = vld [vmem:[%s2618_s10 + $0x20] sm:$0xf]  ;;  %v1557_v61 = vsel %vm647_vm2, %v1554_v34, %v1556_v53  ;;  %s2327_s10 = scalar_lea.vmem %s2326_s9, 2048 }
 0x2aa   : > { %v1532_v60 = vunpack.c.l.bf16 %v2234_v51  ;;  %p2329_p9 = scmp.lt.s32.totalorder %s2327_s10, %s2321_s6 }
 0x2ac   : > { %v1558_v40 = vrot.slane %v1532_v60, 1  ;;  %p2330_p12 = por %p2329_p9, %p2328_p7 }
 0x2ae   : > { %v1461_v58 = vpop.f32.mrb[40].mxu1  ;;  %v1559_v45 = vsel %vm647_vm2, %v1556_v53, %v1558_v40  ;;  %p2331_p1 = pnand %p2330_p12, %p2324_p3 }
 0x2af   : > { %v1499_v62 = vadd.f32 %v1461_v58, %v1311_v12  ;;  %v2075_v63 = vpop.f32.mrb[41].mxu1 }
 0x2b0   : > { %v1464_v42 = vpop.f32.mrb[42].mxu1 }
 0x2b1   : > { %v1515_v2 = vadd.f32 %v2930_v59, %v1499_v62  ;;  %v1500_v3 = vadd.f32 %v1464_v42, %v1314_v15  ;;  %v2076_v5 = vpop.f32.mrb[43].mxu1 }
 0x2b3   : > { %v1569_v9 = vadd.f32 %v1545_v1, %v1515_v2  ;;  %v1516_v10 = vadd.f32 %v2930_v59, %v1500_v3 }
 0x2b5   : > { %v1578_v13 = vmax.f32 %v1569_v9, 0.0  ;;  %v1570_v12 = vadd.f32 %v1547_v6, %v1516_v10 }
 0x2b6   : > { %v1469_v14 = vpop.f32.mrb[44].mxu1 }
 0x2b7   : > { %1587 = vst [vmem:[%s2938_s12] sm:$0xff] %v1578_v13  ;;  %v1579_v15 = vmax.f32 %v1570_v12, 0.0  ;;  %v1501_v17 = vadd.f32 %v1469_v14, %v1319_v20  ;;  %v2079_v18 = vpop.f32.mrb[45].mxu1 }
 0x2b8   : > { %v1472_v50 = vpop.f32.mrb[46].mxu1 }
 0x2b9   : > { %1588 = vst [vmem:[%s2938_s12 + $0x8] sm:$0xff] %v1579_v15  ;;  %v1517_v21 = vadd.f32 %v2930_v59, %v1501_v17  ;;  %v1502_v22 = vadd.f32 %v1472_v50, %v2913_v23  ;;  %v2080_v24 = vpop.f32.mrb[47].mxu1 }
 0x2bb   : > { %v1571_v28 = vadd.f32 %v1549_v19, %v1517_v21  ;;  %v1518_v20 = vadd.f32 %v2930_v59, %v1502_v22 }
 0x2bd   : > { %v1580_v31 = vmax.f32 %v1571_v28, 0.0  ;;  %v1572_v32 = vadd.f32 %v1551_v25, %v1518_v20 }
 0x2be   : > { %v1477_v55 = vpop.f32.mrb[48].mxu1 }
 0x2bf   : > { %1589 = vst [vmem:[%s2938_s12 + $0xe] sm:$0xfc] %v1580_v31  ;;  %v1581_v36 = vmax.f32 %v1572_v32, 0.0  ;;  %v1503_v37 = vadd.f32 %v1477_v55, %v2915_v29  ;;  %v2083_v23 = vpop.f32.mrb[49].mxu1 }
 0x2c0   : > { %v1480_v39 = vpop.f32.mrb[50].mxu1 }
 0x2c1   : > { %1590 = vst [vmem:[%s2938_s12 + $0x16] sm:$0xff] %v1581_v36  ;;  %v1519_v43 = vadd.f32 %v2930_v59, %v1503_v37  ;;  %v1504_v46 = vadd.f32 %v1480_v39, %v2917_v33  ;;  %v2084_v47 = vpop.f32.mrb[51].mxu1 }
 0x2c3   : > { %v1573_v52 = vadd.f32 %v1553_v38, %v1519_v43  ;;  %v1520_v29 = vadd.f32 %v2930_v59, %v1504_v46 }
 0x2c5   : > { %v1582_v4 = vmax.f32 %v1573_v52, 0.0  ;;  %v1574_v54 = vadd.f32 %v1555_v49, %v1520_v29 }
 0x2c6   : > { %v1485_v56 = vpop.f32.mrb[52].mxu1 }
 0x2c7   : > { %1591 = vst [vmem:[%s2938_s12 + $0x1e] sm:$0x3] %v1582_v4  ;;  %1592 = vst [vmem:[%s2938_s12 + $0x1c] sm:$0xf0] %v1582_v4  ;;  %v1583_v57 = vmax.f32 %v1574_v54, 0.0  ;;  %v1505_v33 = vadd.f32 %v1485_v56, %v2919_v41  ;;  %v2087_v58 = vpop.f32.mrb[53].mxu1 }
 0x2c8   : > { %v1488_v62 = vpop.f32.mrb[54].mxu1 }
 0x2c9   : > { %1593 = vst [vmem:[%s2938_s12 + $0x24] sm:$0xff] %v1583_v57  ;;  %v1521_v63 = vadd.f32 %v2930_v59, %v1505_v33  ;;  %v1506_v1 = vadd.f32 %v1488_v62, %v2921_v44  ;;  %v2088_v42 = vpop.f32.mrb[55].mxu1 }
 0x2cb   : > { %v1575_v2 = vadd.f32 %v1557_v61, %v1521_v63  ;;  %v1522_v3 = vadd.f32 %v2930_v59, %v1506_v1 }
 0x2cd   : > { %v1584_v5 = vmax.f32 %v1575_v2, 0.0  ;;  %v1576_v41 = vadd.f32 %v1559_v45, %v1522_v3 }
 0x2ce   : > { %v1493_v6 = vpop.f32.mrb[56].mxu1 }
 0x2cf   : > { %1594 = vst [vmem:[%s2938_s12 + $0x2c] sm:$0xf] %v1584_v5  ;;  %1595 = vst [vmem:[%s2938_s12 + $0x2a] sm:$0xc0] %v1584_v5  ;;  %v1585_v7 = vmax.f32 %v1576_v41, 0.0  ;;  %v1507_v8 = vadd.f32 %v1493_v6, %v2923_v48  ;;  %v2091_v44 = vpop.f32.mrb[57].mxu1 }
 0x2d0   : > { %v1496_v9 = vpop.f32.mrb[58].mxu1 }
 0x2d1   : > { %1596 = vst [vmem:[%s2938_s12 + $0x32] sm:$0xff] %v1585_v7  ;;  %v1523_v10 = vadd.f32 %v2930_v59, %v1507_v8  ;;  %v2092_v11 = vpop.f32.mrb[59].mxu1 }
 0x2d3   : > { %v1577_v13 = vadd.f32 %v1558_v40, %v1523_v10 }
 0x2d5   : > { %v1586_v48 = vmax.f32 %v1577_v13, 0.0 }
 0x2d7   : > { %1597 = vst [vmem:[%s2938_s12 + $0x3a] sm:$0x3f] %v1586_v48 }
 0x2d8   : > { %2334 = shalt.err (!%p2331_p1)
}
 0x2d9   : > { %s2335_s24 = scalar_lea.hbm %s2976_s15, 1024  ;;  %s2339_s8 = scalar_lea.hbm %s3028_s5, 2048 }
 0x2da   : > { %p2336_p13 = scmp.ne.s32.totalorder %s2976_s15, %s2335_s24  ;;  %p2340_p4 = scmp.lt.u32.totalorder %s2976_s15, %s3028_s5 }
 0x2db   : > { %p2341_p5 = scmp.lt.u32.totalorder %s2339_s8, %s2335_s24  ;;  %p2343_p11 = scmp.lt.u32.totalorder %s2335_s24, %s2976_s15 }
 0x2dc   : > { %p2337_p6 = pnand %p2336_p13, %p3062_p0 }
 0x2dd   : > { %p2342_p8 = por %p2341_p5, %p2340_p4 }
 0x2de   : > { %p2338_p10 = pneg %p2337_p6 }
 0x2df   : > { %p2344_p2 = por %p2343_p11, %p2342_p8 }
 0x2e1   : > { %p2345_p3 = pnand %p2344_p2, %p2338_p10 }
 0x2e3   : > { %2348 = shalt.err (!%p2345_p3)
}
 0x2e4   : > { %s2401_s13 = smov 128   ;;  %s2402_s7 = smov 8  }
 0x2e5   : > { %2105 = dma.vmem_to_hbm [thread:$0]  (%p3062_p0), %s2978_s30, 1024, %s2976_s15, %s1599_s14, %s2401_s13, %s2401_s13, %s2402_s7  }
 0x2e6 PF: > { %s1627_s28 = sand.u32 1, %s2379_s18   ;;  %p3063_p7 = scmp.ne.s32.totalorder %s3034_s25, 0 }
 0x2e7   : > { %p3064_p9 = scmp.ge.s32.totalorder %s2391_s21, 2  ;;  %s1628_s6 = scalar_lea.sflag [#allocation5], %s1627_s28 }
 0x2e9   : > { %p2119_p12 = pnand %p3064_p9, %p3063_p7 }
 0x2eb   : > { %2374 = dma.done.wait (!%p2119_p12), %s1628_s6, 1024  }
 0x2ec   : > { %2376 = vsyncadd (!%p2119_p12), %s1628_s6, 4294966272  ;;  %p19_p1 = scmp.ge.s32.totalorder %s2549_s29, 4   ;;  %s3065_s18 = smov %s2383_s19 }
 0x2ed   : > { %s3066_s19 = smov %s2387_s20  ;;  %s3067_s20 = smov %s2565_s27 }
 0x2ee   : > { %s3068_s21 = smov %s2549_s29  ;;  %21 = sbr.rel (!%p19_p1) target bundleno = 6 (0x6), region = 97 }
 0x2f5   :  { %1633 = vsyncpa [#allocation4], 1 }
 0x2f6   :  { %1635 = vsyncpa [#allocation4 + $0x1], 1 }
 0x2f7   :  { %1636 = vsyncpa [#allocation7], 1 }
 0x2f8   :  { %1637 = vsyncpa [#allocation5], 1 }
 0x2f9   :  { %1639 = vsyncpa [#allocation5 + $0x1], 1 }

</bundles_post_ra>
